<compile_context>
chip_gen: v7x
topology: tpu7x:2x2x1
jax: 0.10.0
libtpu: 0.0.40
codegen_flags: <defaults>
</compile_context>

<pallas_src>
import numpy as np
import jax
import jax.numpy as jnp
from jax.experimental import pallas as pl
from jax.experimental.pallas import tpu as pltpu


# Dimensions (lane = 128 granularity for the last dim, sublane = 8 for 2nd-last).
K1   = 400   # conv1 input  : 1*20*20 = 400 (multiple of 8, used as full-dim block)
N1P  = 256   # pooled conv1 : 6*5*5   = 150 -> 256
N2P  = 256   # conv2 output : 16*4*4  = 256 (already aligned)
N3P  = 384   # conv3 output : 32*3*3  = 288 -> 384
NFP  = 128   # fc1 output   : 2       -> 128
MP_MIN = 8   # batch rows padded to a multiple of 8 sublanes
TILE_M_MAX = 256  # per-grid-step batch tile (amortizes weight DMA, shards on v7x)


def _round_up(n, m):
    return ((n + m - 1) // m) * m


# ---------------------------------------------------------------------------
# Fused kernel: 4 MXU matmuls + VPU bias/ReLU/max, everything VMEM/vreg resident.
# ---------------------------------------------------------------------------
def _fused_kernel(x_ref, w1_ref, b1_ref, w2_ref, b2_ref, w3_ref, b3_ref,
                  wf_ref, bf_ref, o_ref):
    x = x_ref[...]                                           # (TM, 400) bf16

    # conv1 (all four 2x2-pool corners fused into one matmul) ...
    z = jnp.dot(x, w1_ref[...], preferred_element_type=jnp.float32)   # (TM, 1024) f32
    # ... then maxpool as a max over the four lane-contiguous corner slices,
    # with bias + ReLU hoisted outside the max (they commute).
    m = jnp.maximum(jnp.maximum(z[:, 0 * N1P:1 * N1P], z[:, 1 * N1P:2 * N1P]),
                    jnp.maximum(z[:, 2 * N1P:3 * N1P], z[:, 3 * N1P:4 * N1P]))
    pooled = jnp.maximum(m + b1_ref[...], 0.0)               # (TM, 256) f32

    # conv2 + ReLU
    a2 = jnp.maximum(
        jnp.dot(pooled.astype(jnp.bfloat16), w2_ref[...],
                preferred_element_type=jnp.float32) + b2_ref[...], 0.0)
    # conv3 + ReLU
    a3 = jnp.maximum(
        jnp.dot(a2.astype(jnp.bfloat16), w3_ref[...],
                preferred_element_type=jnp.float32) + b3_ref[...], 0.0)
    # fc1 + ReLU (lane-dense padded output)
    o_ref[...] = jnp.maximum(
        jnp.dot(a3.astype(jnp.bfloat16), wf_ref[...],
                preferred_element_type=jnp.float32) + bf_ref[...], 0.0)


# ---------------------------------------------------------------------------
# One-time host-side weight packing (conv -> dense matmul matrices, padding).
# ---------------------------------------------------------------------------
def _conv_as_matmul(w, b, ih, iw, stride, pad):
    """Lower PyTorch Conv2d (OIHW weights, channel-major flattened activations)
    to a dense matrix M so that flatten(conv(x)) = flatten(x) @ M + bias."""
    OC, IC, KH, KW = w.shape
    oh = (ih + 2 * pad - KH) // stride + 1
    ow = (iw + 2 * pad - KW) // stride + 1
    rows, cols, widx = [], [], []
    for oc in range(OC):
        for oy in range(oh):
            for ox in range(ow):
                col = (oc * oh + oy) * ow + ox
                for ic in range(IC):
                    for kh in range(KH):
                        for kw in range(KW):
                            y = oy * stride - pad + kh
                            xx = ox * stride - pad + kw
                            if 0 <= y < ih and 0 <= xx < iw:
                                rows.append((ic * ih + y) * iw + xx)
                                cols.append(col)
                                widx.append((oc, ic, kh, kw))
    widx = np.array(widx)
    vals = w[widx[:, 0], widx[:, 1], widx[:, 2], widx[:, 3]].astype(jnp.float32)
    m = jnp.zeros((IC * ih * iw, OC * oh * ow), jnp.float32)
    m = m.at[np.array(rows), np.array(cols)].set(vals)
    bias = jnp.repeat(b.astype(jnp.float32), oh * ow)
    return m, bias, oh, ow


def _pool_cols(channels, oh, ow, dh, dw):
    """Column indices of pool corner (dh,dw) for a 2x2/2 maxpool, channel-major."""
    ph, pw = oh // 2, ow // 2
    return np.array([(c * oh + 2 * y + dh) * ow + 2 * x + dw
                     for c in range(channels) for y in range(ph) for x in range(pw)])


def _pad_to(a, shape):
    out = jnp.zeros(shape, jnp.float32)
    return out.at[tuple(slice(0, s) for s in a.shape)].set(a)


def pack_params(p):
    """Done once, outside the per-step forward. Weights -> bf16, biases -> f32."""
    # conv1 (1->6, k3, s2, p2) on 20x20, fused with the 2x2 maxpool.
    m1, _, oh1, ow1 = _conv_as_matmul(p["w1"], p["b1"], 20, 20, 2, 2)     # (400, 726)
    ph1, pw1 = oh1 // 2, ow1 // 2
    corners = []
    for dh in range(2):
        for dw in range(2):
            cols = _pool_cols(6, oh1, ow1, dh, dw)                        # 150 pooled cols
            corners.append(_pad_to(m1[:, cols], (K1, N1P)))               # (400, 256)
    w1p = jnp.concatenate(corners, axis=1).astype(jnp.bfloat16)           # (400, 1024)
    b1p = _pad_to(jnp.repeat(p["b1"].astype(jnp.float32), ph1 * pw1)[None, :], (1, N1P))

    # conv2 (6->16, k3, s2, p2) on 5x5.
    m2, bias2, oh2, ow2 = _conv_as_matmul(p["w2"], p["b2"], ph1, pw1, 2, 2)   # (150, 256)
    w2p = _pad_to(m2, (N1P, N2P)).astype(jnp.bfloat16)
    b2p = _pad_to(bias2[None, :], (1, N2P))

    # conv3 (16->32, k3, s2, p2) on 4x4.
    m3, bias3, _, _ = _conv_as_matmul(p["w3"], p["b3"], oh2, ow2, 2, 2)       # (256, 288)
    w3p = _pad_to(m3, (N2P, N3P)).astype(jnp.bfloat16)
    b3p = _pad_to(bias3[None, :], (1, N3P))

    # fc1 (288 -> 2).
    wfp = _pad_to(p["wf"].astype(jnp.float32).T, (N3P, NFP)).astype(jnp.bfloat16)
    bfp = _pad_to(p["bf"].astype(jnp.float32)[None, :], (1, NFP))

    return dict(w1=w1p, b1=b1p, w2=w2p, b2=b2p, w3=w3p, b3=b3p, wf=wfp, bf=bfp)


# ---------------------------------------------------------------------------
# Forward pass: one pallas_call, gridded over the batch.
# ---------------------------------------------------------------------------
@jax.jit
def forward(x, packed):
    B = x.shape[0]
    MP = _round_up(max(B, MP_MIN), MP_MIN)
    tile_m = min(MP, TILE_M_MAX)
    MP = _round_up(MP, tile_m)
    grid_m = MP // tile_m

    x_flat = x.reshape(B, -1).astype(jnp.bfloat16)             # (B, 400), (C,H,W) order
    xp = jnp.zeros((MP, K1), jnp.bfloat16).at[:B, :].set(x_flat)

    out = pl.pallas_call(
        _fused_kernel,
        out_shape=jax.ShapeDtypeStruct((MP, NFP), jnp.float32),
        grid=(grid_m,),
        in_specs=[
            pl.BlockSpec((tile_m, K1), lambda i: (i, 0)),
            pl.BlockSpec((K1, 4 * N1P), lambda i: (0, 0)),
            pl.BlockSpec((1, N1P), lambda i: (0, 0)),
            pl.BlockSpec((N1P, N2P), lambda i: (0, 0)),
            pl.BlockSpec((1, N2P), lambda i: (0, 0)),
            pl.BlockSpec((N2P, N3P), lambda i: (0, 0)),
            pl.BlockSpec((1, N3P), lambda i: (0, 0)),
            pl.BlockSpec((N3P, NFP), lambda i: (0, 0)),
            pl.BlockSpec((1, NFP), lambda i: (0, 0)),
        ],
        out_specs=pl.BlockSpec((tile_m, NFP), lambda i: (i, 0)),
        compiler_params=pltpu.CompilerParams(
            dimension_semantics=("parallel",),
            vmem_limit_bytes=32 * 1024 * 1024,
        ),
    )(xp, packed["w1"], packed["b1"], packed["w2"], packed["b2"],
      packed["w3"], packed["b3"], packed["wf"], packed["bf"])

    return out[:B, :2]


# ---------------------------------------------------------------------------
# Pure-JAX reference (numerical sanity check).
# ---------------------------------------------------------------------------
def ref_forward(x, p):
    def conv(x, w, b, stride, pad):
        y = jax.lax.conv_general_dilated(
            x, w, window_strides=(stride, stride),
            padding=((pad, pad), (pad, pad)),
            dimension_numbers=("NCHW", "OIHW", "NCHW"))
        return jax.nn.relu(y + b[None, :, None, None])

    y = conv(x, p["w1"], p["b1"], 2, 2)
    y = jax.lax.reduce_window(y, -jnp.inf, jax.lax.max,
                              (1, 1, 2, 2), (1, 1, 2, 2), "VALID")
    y = conv(y, p["w2"], p["b2"], 2, 2)
    y = conv(y, p["w3"], p["b3"], 2, 2)
    y = y.reshape(y.shape[0], -1)
    return jax.nn.relu(y @ p["wf"].T + p["bf"])


if __name__ == "__main__":
    key = jax.random.PRNGKey(0)
    ks = jax.random.split(key, 9)
    B = 2
    x = jax.random.normal(ks[0], (B, 1, 20, 20), jnp.float32)

    params = {
        "w1": jax.random.normal(ks[1], (6, 1, 3, 3), jnp.float32) * 0.2,
        "b1": jax.random.normal(ks[2], (6,), jnp.float32) * 0.1,
        "w2": jax.random.normal(ks[3], (16, 6, 3, 3), jnp.float32) * 0.1,
        "b2": jax.random.normal(ks[4], (16,), jnp.float32) * 0.1,
        "w3": jax.random.normal(ks[5], (32, 16, 3, 3), jnp.float32) * 0.1,
        "b3": jax.random.normal(ks[6], (32,), jnp.float32) * 0.1,
        "wf": jax.random.normal(ks[7], (2, 288), jnp.float32) * 0.05,
        "bf": jax.random.normal(ks[8], (2,), jnp.float32) * 0.1,
    }

    packed = jax.tree_util.tree_map(jax.block_until_ready, pack_params(params))

    out = jax.block_until_ready(forward(x, packed))
    assert out.shape == (B, 2), out.shape

    ref = jax.block_until_ready(ref_forward(x, params))
    # Slightly looser tolerance than the f32 version to cover bf16 MXU operands.
    assert jnp.allclose(out, ref, atol=3e-2, rtol=3e-2), (out, ref)

    print("KERNEL_OK")
</pallas_src>

<mosaic_0001>
module attributes {stable_mosaic.version = 11 : i64} {
  func.func @_fused_kernel(%arg0: i32, %arg1: memref<8x400xbf16, #tpu.memory_space<vmem>>, %arg2: memref<400x1024xbf16, #tpu.memory_space<vmem>>, %arg3: memref<1x256xf32, #tpu.memory_space<vmem>>, %arg4: memref<256x256xbf16, #tpu.memory_space<vmem>>, %arg5: memref<1x256xf32, #tpu.memory_space<vmem>>, %arg6: memref<256x384xbf16, #tpu.memory_space<vmem>>, %arg7: memref<1x384xf32, #tpu.memory_space<vmem>>, %arg8: memref<384x128xbf16, #tpu.memory_space<vmem>>, %arg9: memref<1x128xf32, #tpu.memory_space<vmem>>, %arg10: memref<8x128xf32, #tpu.memory_space<vmem>>) attributes {dimension_semantics = [#tpu.dimension_semantics<parallel>], iteration_bounds = array<i64: 1>, scalar_prefetch = 0 : i64, scratch_operands = 0 : i64, tpu.core_type = #tpu.core_type<tc>, window_params = [{transform_indices = @transform_0, window_bounds = array<i64: 8, 400>}, {pipeline_mode = #tpu.pipeline_mode<synchronous>, transform_indices = @transform_1, window_bounds = array<i64: 400, 1024>}, {pipeline_mode = #tpu.pipeline_mode<synchronous>, transform_indices = @transform_2, window_bounds = array<i64: 1, 256>}, {pipeline_mode = #tpu.pipeline_mode<synchronous>, transform_indices = @transform_3, window_bounds = array<i64: 256, 256>}, {pipeline_mode = #tpu.pipeline_mode<synchronous>, transform_indices = @transform_4, window_bounds = array<i64: 1, 256>}, {pipeline_mode = #tpu.pipeline_mode<synchronous>, transform_indices = @transform_5, window_bounds = array<i64: 256, 384>}, {pipeline_mode = #tpu.pipeline_mode<synchronous>, transform_indices = @transform_6, window_bounds = array<i64: 1, 384>}, {pipeline_mode = #tpu.pipeline_mode<synchronous>, transform_indices = @transform_7, window_bounds = array<i64: 384, 128>}, {pipeline_mode = #tpu.pipeline_mode<synchronous>, transform_indices = @transform_8, window_bounds = array<i64: 1, 128>}, {transform_indices = @transform_9, window_bounds = array<i64: 8, 128>}]} {
    %c0 = arith.constant 0 : index
    %c0_0 = arith.constant 0 : index
    %0 = vector.load %arg1[%c0, %c0_0] : memref<8x400xbf16, #tpu.memory_space<vmem>>, vector<8x400xbf16>
    %c0_1 = arith.constant 0 : index
    %c0_2 = arith.constant 0 : index
    %1 = vector.load %arg2[%c0_1, %c0_2] : memref<400x1024xbf16, #tpu.memory_space<vmem>>, vector<400x1024xbf16>
    %cst = arith.constant dense<0.000000e+00> : vector<8x1024xf32>
    %2 = tpu.matmul %0, %1, %cst {dimension_numbers = #tpu.dot_dimension_numbers<[1], [0], [0], [1], [0, 0, 1, 1], [], []>} : vector<8x400xbf16>, vector<400x1024xbf16>, vector<8x1024xf32> -> vector<8x1024xf32>
    %3 = vector.extract_strided_slice %2 {offsets = [0, 0], sizes = [8, 256], strides = [1, 1]} : vector<8x1024xf32> to vector<8x256xf32>
    %4 = vector.extract_strided_slice %2 {offsets = [0, 256], sizes = [8, 256], strides = [1, 1]} : vector<8x1024xf32> to vector<8x256xf32>
    %5 = arith.maximumf %3, %4 : vector<8x256xf32>
    %6 = vector.extract_strided_slice %2 {offsets = [0, 512], sizes = [8, 256], strides = [1, 1]} : vector<8x1024xf32> to vector<8x256xf32>
    %7 = vector.extract_strided_slice %2 {offsets = [0, 768], sizes = [8, 256], strides = [1, 1]} : vector<8x1024xf32> to vector<8x256xf32>
    %8 = arith.maximumf %6, %7 : vector<8x256xf32>
    %9 = arith.maximumf %5, %8 : vector<8x256xf32>
    %c0_3 = arith.constant 0 : index
    %c0_4 = arith.constant 0 : index
    %10 = vector.load %arg3[%c0_3, %c0_4] : memref<1x256xf32, #tpu.memory_space<vmem>>, vector<1x256xf32>
    %11 = vector.broadcast %10 : vector<1x256xf32> to vector<8x256xf32>
    %12 = arith.addf %9, %11 : vector<8x256xf32>
    %cst_5 = arith.constant 0.000000e+00 : f32
    %13 = vector.broadcast %cst_5 : f32 to vector<8x256xf32>
    %14 = arith.maximumf %12, %13 : vector<8x256xf32>
    %15 = arith.truncf %14 : vector<8x256xf32> to vector<8x256xbf16>
    %c0_6 = arith.constant 0 : index
    %c0_7 = arith.constant 0 : index
    %16 = vector.load %arg4[%c0_6, %c0_7] : memref<256x256xbf16, #tpu.memory_space<vmem>>, vector<256x256xbf16>
    %cst_8 = arith.constant dense<0.000000e+00> : vector<8x256xf32>
    %17 = tpu.matmul %15, %16, %cst_8 {dimension_numbers = #tpu.dot_dimension_numbers<[1], [0], [0], [1], [0, 0, 1, 1], [], []>} : vector<8x256xbf16>, vector<256x256xbf16>, vector<8x256xf32> -> vector<8x256xf32>
    %c0_9 = arith.constant 0 : index
    %c0_10 = arith.constant 0 : index
    %18 = vector.load %arg5[%c0_9, %c0_10] : memref<1x256xf32, #tpu.memory_space<vmem>>, vector<1x256xf32>
    %19 = vector.broadcast %18 : vector<1x256xf32> to vector<8x256xf32>
    %20 = arith.addf %17, %19 : vector<8x256xf32>
    %cst_11 = arith.constant 0.000000e+00 : f32
    %21 = vector.broadcast %cst_11 : f32 to vector<8x256xf32>
    %22 = arith.maximumf %20, %21 : vector<8x256xf32>
    %23 = arith.truncf %22 : vector<8x256xf32> to vector<8x256xbf16>
    %c0_12 = arith.constant 0 : index
    %c0_13 = arith.constant 0 : index
    %24 = vector.load %arg6[%c0_12, %c0_13] : memref<256x384xbf16, #tpu.memory_space<vmem>>, vector<256x384xbf16>
    %cst_14 = arith.constant dense<0.000000e+00> : vector<8x384xf32>
    %25 = tpu.matmul %23, %24, %cst_14 {dimension_numbers = #tpu.dot_dimension_numbers<[1], [0], [0], [1], [0, 0, 1, 1], [], []>} : vector<8x256xbf16>, vector<256x384xbf16>, vector<8x384xf32> -> vector<8x384xf32>
    %c0_15 = arith.constant 0 : index
    %c0_16 = arith.constant 0 : index
    %26 = vector.load %arg7[%c0_15, %c0_16] : memref<1x384xf32, #tpu.memory_space<vmem>>, vector<1x384xf32>
    %27 = vector.broadcast %26 : vector<1x384xf32> to vector<8x384xf32>
    %28 = arith.addf %25, %27 : vector<8x384xf32>
    %cst_17 = arith.constant 0.000000e+00 : f32
    %29 = vector.broadcast %cst_17 : f32 to vector<8x384xf32>
    %30 = arith.maximumf %28, %29 : vector<8x384xf32>
    %31 = arith.truncf %30 : vector<8x384xf32> to vector<8x384xbf16>
    %c0_18 = arith.constant 0 : index
    %c0_19 = arith.constant 0 : index
    %32 = vector.load %arg8[%c0_18, %c0_19] : memref<384x128xbf16, #tpu.memory_space<vmem>>, vector<384x128xbf16>
    %cst_20 = arith.constant dense<0.000000e+00> : vector<8x128xf32>
    %33 = tpu.matmul %31, %32, %cst_20 {dimension_numbers = #tpu.dot_dimension_numbers<[1], [0], [0], [1], [0, 0, 1, 1], [], []>} : vector<8x384xbf16>, vector<384x128xbf16>, vector<8x128xf32> -> vector<8x128xf32>
    %c0_21 = arith.constant 0 : index
    %c0_22 = arith.constant 0 : index
    %34 = vector.load %arg9[%c0_21, %c0_22] : memref<1x128xf32, #tpu.memory_space<vmem>>, vector<1x128xf32>
    %35 = vector.broadcast %34 : vector<1x128xf32> to vector<8x128xf32>
    %36 = arith.addf %33, %35 : vector<8x128xf32>
    %cst_23 = arith.constant 0.000000e+00 : f32
    %37 = vector.broadcast %cst_23 : f32 to vector<8x128xf32>
    %38 = arith.maximumf %36, %37 : vector<8x128xf32>
    %c0_24 = arith.constant 0 : index
    %c0_25 = arith.constant 0 : index
    %39 = vector.load %arg10[%c0_24, %c0_25] : memref<8x128xf32, #tpu.memory_space<vmem>>, vector<8x128xf32>
    tpu.vector_store %arg10[%c0_24, %c0_25], %38 {strides = array<i32>} : memref<8x128xf32, #tpu.memory_space<vmem>>, vector<8x128xf32>,
    return
  }
  func.func @transform_0(%arg0: i32) -> (i32, i32) {
    %c0_i32 = arith.constant 0 : i32
    %c0_i32_0 = arith.constant 0 : i32
    return %arg0, %c0_i32 : i32, i32
  }
  func.func @transform_1(%arg0: i32) -> (i32, i32) {
    %c0_i32 = arith.constant 0 : i32
    %c0_i32_0 = arith.constant 0 : i32
    %c0_i32_1 = arith.constant 0 : i32
    return %c0_i32, %c0_i32_0 : i32, i32
  }
  func.func @transform_2(%arg0: i32) -> (i32, i32) {
    %c0_i32 = arith.constant 0 : i32
    %c0_i32_0 = arith.constant 0 : i32
    %c0_i32_1 = arith.constant 0 : i32
    return %c0_i32, %c0_i32_0 : i32, i32
  }
  func.func @transform_3(%arg0: i32) -> (i32, i32) {
    %c0_i32 = arith.constant 0 : i32
    %c0_i32_0 = arith.constant 0 : i32
    %c0_i32_1 = arith.constant 0 : i32
    return %c0_i32, %c0_i32_0 : i32, i32
  }
  func.func @transform_4(%arg0: i32) -> (i32, i32) {
    %c0_i32 = arith.constant 0 : i32
    %c0_i32_0 = arith.constant 0 : i32
    %c0_i32_1 = arith.constant 0 : i32
    return %c0_i32, %c0_i32_0 : i32, i32
  }
  func.func @transform_5(%arg0: i32) -> (i32, i32) {
    %c0_i32 = arith.constant 0 : i32
    %c0_i32_0 = arith.constant 0 : i32
    %c0_i32_1 = arith.constant 0 : i32
    return %c0_i32, %c0_i32_0 : i32, i32
  }
  func.func @transform_6(%arg0: i32) -> (i32, i32) {
    %c0_i32 = arith.constant 0 : i32
    %c0_i32_0 = arith.constant 0 : i32
    %c0_i32_1 = arith.constant 0 : i32
    return %c0_i32, %c0_i32_0 : i32, i32
  }
  func.func @transform_7(%arg0: i32) -> (i32, i32) {
    %c0_i32 = arith.constant 0 : i32
    %c0_i32_0 = arith.constant 0 : i32
    %c0_i32_1 = arith.constant 0 : i32
    return %c0_i32, %c0_i32_0 : i32, i32
  }
  func.func @transform_8(%arg0: i32) -> (i32, i32) {
    %c0_i32 = arith.constant 0 : i32
    %c0_i32_0 = arith.constant 0 : i32
    %c0_i32_1 = arith.constant 0 : i32
    return %c0_i32, %c0_i32_0 : i32, i32
  }
  func.func @transform_9(%arg0: i32) -> (i32, i32) {
    %c0_i32 = arith.constant 0 : i32
    %c0_i32_0 = arith.constant 0 : i32
    return %arg0, %c0_i32 : i32, i32
  }
}

</mosaic_0001>

<bundles_post_ra>
// kernel: forward.1
= control target key start
LH: loop header
LB: loop body
LE: loop exit
PB: predicated region body
PF: predicated region fallthrough
CT: control target
= control target key end

     0   :  { %14 = vsyncpa [#allocation3], 0  ;;  %s3479_s0 = inlined_call_operand.vmem [shape: bf16[8,400], index: 0, kind: input, shape index: {}]   ;;  %s3480_s1 = inlined_call_operand.hbm [shape: bf16[400,1024], index: 1, kind: input, shape index: {}]   ;;  %s3481_s2 = inlined_call_operand.vmem [shape: f32[1,256], index: 2, kind: input, shape index: {}]   ;;  %s3482_s3 = inlined_call_operand.hbm [shape: bf16[256,256], index: 3, kind: input, shape index: {}]   ;;  %s3483_s4 = inlined_call_operand.vmem [shape: f32[1,256], index: 4, kind: input, shape index: {}]   ;;  %s3484_s5 = inlined_call_operand.hbm [shape: bf16[256,384], index: 5, kind: input, shape index: {}]   ;;  %s3485_s6 = inlined_call_operand.vmem [shape: f32[1,384], index: 6, kind: input, shape index: {}]   ;;  %s3486_s7 = inlined_call_operand.hbm [shape: bf16[384,128], index: 7, kind: input, shape index: {}]   ;;  %s3487_s8 = inlined_call_operand.vmem [shape: f32[1,128], index: 8, kind: input, shape index: {}]   ;;  %s3488_s9 = inlined_call_operand.vmem [shape: f32[8,128], index: 9, kind: output, shape index: {}]  }
   0x1   :  { %15 = vsyncpa [#allocation5], 0 }
   0x2   :  { %16 = vsyncpa [#allocation8], 0  ;;  %s3270_s30 = smov [#allocation4]   ;;  %s3176_s13 = scalar_lea.hbm %s3482_s3, 4096 }
   0x3   :  { %s38_s10 = sshll.u32 %s3270_s30, 4  ;;  %p3177_p0 = scmp.ne.s32.totalorder %s3482_s3, %s3176_s13  ;;  %s39_s10 = int_to_ptr.vmem [resolvable:$true] %s38_s10 }
   0x4   :  { %p3180_p1 = scmp.lt.u32.totalorder %s3176_s13, %s3482_s3 }
   0x6   :  { %p3182_p2 = pnand %p3180_p1, %p3177_p0 }
   0x8   :  { %3185 = shalt.err (!%p3182_p2)
}
   0x9   :  { %s3186_s18 = scalar_lea.vmem %s39_s10, 4096  ;;  %p3191_p4 = scmp.lt.s32.totalorder %s39_s10, %s39_s10 }
   0xa   :  { %p3187_p3 = scmp.ne.s32.totalorder %s39_s10, %s3186_s18  ;;  %p3192_p5 = scmp.lt.s32.totalorder %s3186_s18, %s3186_s18 }
   0xc   :  { %p3193_p6 = por %p3192_p5, %p3191_p4 }
   0xe   :  { %p3194_p7 = pnand %p3193_p6, %p3187_p3 }
  0x10   :  { %3197 = shalt.err (!%p3194_p7)
}
  0x11   :  { %s3271_s19 = smov 128   ;;  %s3272_s20 = smov 8  }
  0x12   :  { %44 = dma.hbm_to_vmem [thread:$0]  %s3482_s3, 4096, %s39_s10, [#allocation5], %s3271_s19, %s3271_s19, %s3272_s20  }
  0x13   :  { %s3273_s23 = smov [#allocation2]   ;;  %s3198_s27 = scalar_lea.hbm %s3480_s1, 25600 }
  0x14   :  { %s24_s24 = sshll.u32 %s3273_s23, 4  ;;  %p3199_p8 = scmp.ne.s32.totalorder %s3480_s1, %s3198_s27  ;;  %s25_s24 = int_to_ptr.vmem [resolvable:$true] %s24_s24 }
  0x15   :  { %p3202_p9 = scmp.lt.u32.totalorder %s3198_s27, %s3480_s1 }
  0x17   :  { %p3204_p10 = pnand %p3202_p9, %p3199_p8 }
  0x19   :  { %3207 = shalt.err (!%p3204_p10)
}
  0x1a   :  { %s3208_s12 = scalar_lea.vmem %s25_s24, 25600  ;;  %p3213_p12 = scmp.lt.s32.totalorder %s25_s24, %s25_s24 }
  0x1b   :  { %p3209_p11 = scmp.ne.s32.totalorder %s25_s24, %s3208_s12  ;;  %p3214_p13 = scmp.lt.s32.totalorder %s3208_s12, %s3208_s12 }
  0x1d   :  { %p3215_p0 = por %p3214_p13, %p3213_p12 }
  0x1f   :  { %p3216_p1 = pnand %p3215_p0, %p3209_p11 }
  0x21   :  { %3219 = shalt.err (!%p3216_p1)
}
  0x22   :  { %s3274_s3 = smov 512   ;;  %s3275_s10 = smov 32  }
  0x23   :  { %30 = dma.hbm_to_vmem [thread:$0]  %s3480_s1, 25600, %s25_s24, [#allocation3], %s3274_s3, %s3274_s3, %s3275_s10  }
  0x24   :  { %s3276_s15 = smov [#allocation6]   ;;  %s3220_s19 = scalar_lea.hbm %s3484_s5, 6144 }
  0x25   :  { %s52_s16 = sshll.u32 %s3276_s15, 4  ;;  %p3221_p2 = scmp.ne.s32.totalorder %s3484_s5, %s3220_s19  ;;  %s53_s16 = int_to_ptr.vmem [resolvable:$true] %s52_s16 }
  0x26   :  { %p3224_p3 = scmp.lt.u32.totalorder %s3220_s19, %s3484_s5 }
  0x28   :  { %p3226_p4 = pnand %p3224_p3, %p3221_p2 }
  0x2a   :  { %3229 = shalt.err (!%p3226_p4)
}
  0x2b   :  { %s3230_s25 = scalar_lea.vmem %s53_s16, 6144  ;;  %p3235_p6 = scmp.lt.s32.totalorder %s53_s16, %s53_s16 }
  0x2c   :  { %p3231_p5 = scmp.ne.s32.totalorder %s53_s16, %s3230_s25  ;;  %p3236_p7 = scmp.lt.s32.totalorder %s3230_s25, %s3230_s25 }
  0x2e   :  { %p3237_p8 = por %p3236_p7, %p3235_p6 }
  0x30   :  { %p3238_p9 = pnand %p3237_p8, %p3231_p5 }
  0x32   :  { %3241 = shalt.err (!%p3238_p9)
}
  0x33   :  { %s3277_s1 = smov 192   ;;  %s3278_s24 = smov 12  }
  0x34   :  { %58 = dma.hbm_to_vmem [thread:$0]  %s3484_s5, 6144, %s53_s16, [#allocation5], %s3277_s1, %s3277_s1, %s3278_s24  }
  0x35   :  { %s3279_s28 = smov [#allocation7]   ;;  %s3242_s12 = scalar_lea.hbm %s3486_s7, 3072 }
  0x36   :  { %s66_s29 = sshll.u32 %s3279_s28, 4  ;;  %p3243_p10 = scmp.ne.s32.totalorder %s3486_s7, %s3242_s12  ;;  %s67_s29 = int_to_ptr.vmem [resolvable:$true] %s66_s29 }
  0x37   :  { %p3246_p11 = scmp.lt.u32.totalorder %s3242_s12, %s3486_s7 }
  0x39   :  { %p3248_p12 = pnand %p3246_p11, %p3243_p10 }
  0x3b   :  { %3251 = shalt.err (!%p3248_p12)
}
  0x3c   :  { %s3252_s15 = scalar_lea.vmem %s67_s29, 3072  ;;  %p3257_p0 = scmp.lt.s32.totalorder %s67_s29, %s67_s29 }
  0x3d   :  { %p3253_p13 = scmp.ne.s32.totalorder %s67_s29, %s3252_s15  ;;  %p3258_p1 = scmp.lt.s32.totalorder %s3252_s15, %s3252_s15 }
  0x3f   :  { %p3259_p2 = por %p3258_p1, %p3257_p0 }
  0x41   :  { %p3260_p3 = pnand %p3259_p2, %p3253_p13 }
  0x43   :  { %3263 = shalt.err (!%p3260_p3)
}
  0x44   :  { %s3280_s5 = smov 64   ;;  %s3281_s16 = smov 4  }
  0x45   :  { %72 = dma.hbm_to_vmem [thread:$0]  %s3486_s7, 3072, %s67_s29, [#allocation8], %s3280_s5, %s3280_s5, %s3281_s16  }
  0x46   :  { %3264 = dma.done.wait [#allocation3], 25600  }
  0x47   :  { %3265 = vsyncadd [#allocation3], 4294941696 }
  0x48   :  { %3266 = dma.done.wait [#allocation5], 10240  }
  0x49   :  { %3267 = vsyncadd [#allocation5], 4294957056 }
  0x4a   :  { %3268 = dma.done.wait [#allocation8], 3072  }
  0x4b   :  { %3269 = vsyncadd [#allocation8], 4294964224  ;;  %v90_v0 = vld [vmem:[#allocation2] sm:$0xff]  ;;  %v91_v2 = vld [vmem:[#allocation2 + $0x8] sm:$0xff]  ;;  %vm1303_vm0 = vcmask 130048   ;;  %vm3283_vm1 = vmmov 0  }
  0x4c   :  { %v94_v1 = vld [vmem:[#allocation2 + $0x20] sm:$0xff]  ;;  %v95_v4 = vld [vmem:[#allocation2 + $0x28] sm:$0xff] }
  0x4d   :  { %v2625_v3 = vcombine.high %v90_v0, %v94_v1  ;;  %v2624_v5 = vcombine.low %v90_v0, %v94_v1  ;;  %v98_v6 = vld [vmem:[#allocation2 + $0x40] sm:$0xff]  ;;  %v2627_v8 = vcombine.high %v91_v2, %v95_v4  ;;  %v2626_v9 = vcombine.low %v91_v2, %v95_v4  ;;  %v99_v11 = vld [vmem:[#allocation2 + $0x48] sm:$0xff] }
  0x4e   :  { %v102_v7 = vld [vmem:[#allocation2 + $0x60] sm:$0xff]  ;;  %v103_v12 = vld [vmem:[#allocation2 + $0x68] sm:$0xff] }
  0x4f   :  { %v2633_v10 = vcombine.high %v98_v6, %v102_v7  ;;  %v106_v13 = vld [vmem:[#allocation2 + $0x80] sm:$0xff]  ;;  %1307 = vmatprep.subr.bf16.mxu0 %v2625_v3  ;;  %v2635_v14 = vcombine.high %v99_v11, %v103_v12  ;;  %v107_v16 = vld [vmem:[#allocation2 + $0x88] sm:$0xff]  ;;  %1389 = vmatprep.subr.bf16.mxu1 %v2627_v8  ;;  %v2632_v18 = vcombine.low %v98_v6, %v102_v7 }
  0x50   :  { %v110_v15 = vld [vmem:[#allocation2 + $0xa0] sm:$0xff]  ;;  %v111_v17 = vld [vmem:[#allocation2 + $0xa8] sm:$0xff]  ;;  %1308 = vmatpush1.bf16.msra.mxu0 %v2624_v5  ;;  %1390 = vmatpush1.bf16.msra.mxu1 %v2626_v9  ;;  %v2634_v19 = vcombine.low %v99_v11, %v103_v12 }
  0x51   :  { %1309 = vmatprep.subr.bf16.mxu0 %v2633_v10  ;;  %v2641_v20 = vcombine.high %v106_v13, %v110_v15  ;;  %1391 = vmatprep.subr.bf16.mxu1 %v2635_v14  ;;  %v2643_v21 = vcombine.high %v107_v16, %v111_v17  ;;  %v114_v22 = vld [vmem:[#allocation2 + $0xc0] sm:$0xff]  ;;  %v115_v24 = vld [vmem:[#allocation2 + $0xc8] sm:$0xff]  ;;  %v2640_v26 = vcombine.low %v106_v13, %v110_v15 }
  0x52   :  { %v118_v23 = vld [vmem:[#allocation2 + $0xe0] sm:$0xff]  ;;  %v119_v25 = vld [vmem:[#allocation2 + $0xe8] sm:$0xff]  ;;  %v2642_v27 = vcombine.low %v107_v16, %v111_v17 }
  0x53   :  { %v2649_v28 = vcombine.high %v114_v22, %v118_v23  ;;  %v2651_v29 = vcombine.high %v115_v24, %v119_v25  ;;  %v122_v30 = vld [vmem:[#allocation2 + $0x100] sm:$0xff]  ;;  %v123_v32 = vld [vmem:[#allocation2 + $0x108] sm:$0xff]  ;;  %v2648_v34 = vcombine.low %v114_v22, %v118_v23  ;;  %v2650_v35 = vcombine.low %v115_v24, %v119_v25 }
  0x54   :  { %1310 = vmatpush1.bf16.msra.mxu0 %v2632_v18  ;;  %1392 = vmatpush1.bf16.msra.mxu1 %v2634_v19  ;;  %v126_v31 = vld [vmem:[#allocation2 + $0x120] sm:$0xff]  ;;  %v127_v33 = vld [vmem:[#allocation2 + $0x128] sm:$0xff] }
  0x55   :  { %1311 = vmatprep.subr.bf16.mxu0 %v2641_v20  ;;  %1393 = vmatprep.subr.bf16.mxu1 %v2643_v21  ;;  %v2657_v36 = vcombine.high %v122_v30, %v126_v31  ;;  %v2659_v37 = vcombine.high %v123_v32, %v127_v33  ;;  %v130_v38 = vld [vmem:[#allocation2 + $0x140] sm:$0xff]  ;;  %v131_v40 = vld [vmem:[#allocation2 + $0x148] sm:$0xff]  ;;  %v2656_v42 = vcombine.low %v122_v30, %v126_v31 }
  0x56   :  { %v134_v39 = vld [vmem:[#allocation2 + $0x160] sm:$0xff]  ;;  %v135_v41 = vld [vmem:[#allocation2 + $0x168] sm:$0xff]  ;;  %v2658_v43 = vcombine.low %v123_v32, %v127_v33 }
  0x57   :  { %v2665_v44 = vcombine.high %v130_v38, %v134_v39  ;;  %v2667_v45 = vcombine.high %v131_v40, %v135_v41  ;;  %v138_v46 = vld [vmem:[#allocation2 + $0x180] sm:$0xff]  ;;  %v139_v48 = vld [vmem:[#allocation2 + $0x188] sm:$0xff]  ;;  %v2664_v50 = vcombine.low %v130_v38, %v134_v39  ;;  %v2666_v51 = vcombine.low %v131_v40, %v135_v41 }
  0x58   :  { %1312 = vmatpush1.bf16.msra.mxu0 %v2640_v26  ;;  %1394 = vmatpush1.bf16.msra.mxu1 %v2642_v27  ;;  %v142_v47 = vld [vmem:[#allocation2 + $0x1a0] sm:$0xff]  ;;  %v143_v49 = vld [vmem:[#allocation2 + $0x1a8] sm:$0xff] }
  0x59   :  { %1313 = vmatprep.subr.bf16.mxu0 %v2649_v28  ;;  %1395 = vmatprep.subr.bf16.mxu1 %v2651_v29  ;;  %v2673_v52 = vcombine.high %v138_v46, %v142_v47  ;;  %v3385_v53 = vld [vmem:[%s3479_s0] sm:$0xff]  ;;  %v2675_v54 = vcombine.high %v139_v48, %v143_v49  ;;  %v147_v58 = vld [vmem:[#allocation2 + $0x1c8] sm:$0xff]  ;;  %v2672_v60 = vcombine.low %v138_v46, %v142_v47 }
  0x5a   :  { %v146_v55 = vld [vmem:[#allocation2 + $0x1c0] sm:$0xff]  ;;  %v3389_v57 = vcombine.high %v3385_v53, %v3385_v53  ;;  %v151_v59 = vld [vmem:[#allocation2 + $0x1e8] sm:$0xff]  ;;  %v2674_v61 = vcombine.low %v139_v48, %v143_v49 }
  0x5b   :  { %v150_v56 = vld [vmem:[#allocation2 + $0x1e0] sm:$0xff]  ;;  %v2683_v63 = vcombine.high %v147_v58, %v151_v59  ;;  %v155_v2 = vld [vmem:[#allocation2 + $0x208] sm:$0xff]  ;;  %v2682_v5 = vcombine.low %v147_v58, %v151_v59 }
  0x5c   :  { %1314 = vmatpush1.bf16.msra.mxu0 %v2648_v34  ;;  %1396 = vmatpush1.bf16.msra.mxu1 %v2650_v35  ;;  %v2681_v62 = vcombine.high %v146_v55, %v150_v56  ;;  %v154_v0 = vld [vmem:[#allocation2 + $0x200] sm:$0xff]  ;;  %v159_v3 = vld [vmem:[#allocation2 + $0x228] sm:$0xff]  ;;  %v2680_v4 = vcombine.low %v146_v55, %v150_v56 }
  0x5d   :  { %1315 = vmatprep.subr.bf16.mxu0 %v2657_v36  ;;  %1397 = vmatprep.subr.bf16.mxu1 %v2659_v37  ;;  %v158_v1 = vld [vmem:[#allocation2 + $0x220] sm:$0xff]  ;;  %v2691_v7 = vcombine.high %v155_v2, %v159_v3  ;;  %v163_v10 = vld [vmem:[#allocation2 + $0x248] sm:$0xff]  ;;  %v2690_v13 = vcombine.low %v155_v2, %v159_v3 }
  0x5e   :  { %1339 = vmatprep.mubr.bf16.mxu0 %v3389_v57  ;;  %1421 = vmatprep.mubr.bf16.mxu1 %v3389_v57  ;;  %v2689_v6 = vcombine.high %v154_v0, %v158_v1  ;;  %v162_v8 = vld [vmem:[#allocation2 + $0x240] sm:$0xff]  ;;  %v167_v11 = vld [vmem:[#allocation2 + $0x268] sm:$0xff]  ;;  %v2688_v12 = vcombine.low %v154_v0, %v158_v1 }
  0x5f   :  { %v166_v9 = vld [vmem:[#allocation2 + $0x260] sm:$0xff]  ;;  %v2699_v15 = vcombine.high %v163_v10, %v167_v11  ;;  %v171_v18 = vld [vmem:[#allocation2 + $0x288] sm:$0xff]  ;;  %v2698_v21 = vcombine.low %v163_v10, %v167_v11 }
  0x60   :  { %1316 = vmatpush1.bf16.msra.mxu0 %v2656_v42  ;;  %1398 = vmatpush1.bf16.msra.mxu1 %v2658_v43  ;;  %v2697_v14 = vcombine.high %v162_v8, %v166_v9  ;;  %v170_v16 = vld [vmem:[#allocation2 + $0x280] sm:$0xff]  ;;  %v175_v19 = vld [vmem:[#allocation2 + $0x2a8] sm:$0xff]  ;;  %v2696_v20 = vcombine.low %v162_v8, %v166_v9 }
  0x61   :  { %1317 = vmatprep.subr.bf16.mxu0 %v2665_v44  ;;  %1399 = vmatprep.subr.bf16.mxu1 %v2667_v45  ;;  %v174_v17 = vld [vmem:[#allocation2 + $0x2a0] sm:$0xff]  ;;  %v2707_v23 = vcombine.high %v171_v18, %v175_v19  ;;  %v179_v26 = vld [vmem:[#allocation2 + $0x2c8] sm:$0xff]  ;;  %v2706_v29 = vcombine.low %v171_v18, %v175_v19 }
  0x62   :  { %v2705_v22 = vcombine.high %v170_v16, %v174_v17  ;;  %v178_v24 = vld [vmem:[#allocation2 + $0x2c0] sm:$0xff]  ;;  %v183_v27 = vld [vmem:[#allocation2 + $0x2e8] sm:$0xff]  ;;  %v2704_v28 = vcombine.low %v170_v16, %v174_v17 }
  0x63   :  { %v182_v25 = vld [vmem:[#allocation2 + $0x2e0] sm:$0xff]  ;;  %v2715_v31 = vcombine.high %v179_v26, %v183_v27  ;;  %v187_v34 = vld [vmem:[#allocation2 + $0x308] sm:$0xff]  ;;  %v2714_v37 = vcombine.low %v179_v26, %v183_v27 }
  0x64   :  { %1318 = vmatpush1.bf16.msra.mxu0 %v2664_v50  ;;  %1400 = vmatpush1.bf16.msra.mxu1 %v2666_v51  ;;  %v2713_v30 = vcombine.high %v178_v24, %v182_v25  ;;  %v186_v32 = vld [vmem:[#allocation2 + $0x300] sm:$0xff]  ;;  %v191_v35 = vld [vmem:[#allocation2 + $0x328] sm:$0xff]  ;;  %v2712_v36 = vcombine.low %v178_v24, %v182_v25 }
  0x65   :  { %1319 = vmatprep.subr.bf16.mxu0 %v2673_v52  ;;  %1401 = vmatprep.subr.bf16.mxu1 %v2675_v54  ;;  %v190_v33 = vld [vmem:[#allocation2 + $0x320] sm:$0xff]  ;;  %v2723_v39 = vcombine.high %v187_v34, %v191_v35  ;;  %v195_v42 = vld [vmem:[#allocation2 + $0x348] sm:$0xff]  ;;  %v2722_v45 = vcombine.low %v187_v34, %v191_v35 }
  0x66   :  { %v2721_v38 = vcombine.high %v186_v32, %v190_v33  ;;  %v194_v40 = vld [vmem:[#allocation2 + $0x340] sm:$0xff]  ;;  %v199_v43 = vld [vmem:[#allocation2 + $0x368] sm:$0xff]  ;;  %v2720_v44 = vcombine.low %v186_v32, %v190_v33 }
  0x67   :  { %v198_v41 = vld [vmem:[#allocation2 + $0x360] sm:$0xff]  ;;  %v2731_v47 = vcombine.high %v195_v42, %v199_v43  ;;  %v203_v50 = vld [vmem:[#allocation2 + $0x388] sm:$0xff]  ;;  %v2730_v54 = vcombine.low %v195_v42, %v199_v43 }
  0x68   :  { %1320 = vmatpush1.bf16.msra.mxu0 %v2672_v60  ;;  %1402 = vmatpush1.bf16.msra.mxu1 %v2674_v61  ;;  %v2729_v46 = vcombine.high %v194_v40, %v198_v41  ;;  %v202_v48 = vld [vmem:[#allocation2 + $0x380] sm:$0xff]  ;;  %v207_v51 = vld [vmem:[#allocation2 + $0x3a8] sm:$0xff]  ;;  %v2728_v52 = vcombine.low %v194_v40, %v198_v41 }
  0x69   :  { %1321 = vmatprep.subr.bf16.mxu0 %v2681_v62  ;;  %1403 = vmatprep.subr.bf16.mxu1 %v2683_v63  ;;  %v206_v49 = vld [vmem:[#allocation2 + $0x3a0] sm:$0xff]  ;;  %v2739_v56 = vcombine.high %v203_v50, %v207_v51  ;;  %v211_v60 = vld [vmem:[#allocation2 + $0x3c8] sm:$0xff]  ;;  %v2738_v63 = vcombine.low %v203_v50, %v207_v51 }
  0x6a   :  { %v2737_v55 = vcombine.high %v202_v48, %v206_v49  ;;  %v210_v58 = vld [vmem:[#allocation2 + $0x3c0] sm:$0xff]  ;;  %v215_v61 = vld [vmem:[#allocation2 + $0x3e8] sm:$0xff]  ;;  %v2736_v62 = vcombine.low %v202_v48, %v206_v49 }
  0x6b   :  { %v214_v59 = vld [vmem:[#allocation2 + $0x3e0] sm:$0xff]  ;;  %v2747_v1 = vcombine.high %v211_v60, %v215_v61 }
  0x6c   :  { %1322 = vmatpush1.bf16.msra.mxu0 %v2680_v4  ;;  %1404 = vmatpush1.bf16.msra.mxu1 %v2682_v5  ;;  %v2745_v0 = vcombine.high %v210_v58, %v214_v59  ;;  %v218_v2 = vld [vmem:[#allocation2 + $0x400] sm:$0xff]  ;;  %v219_v4 = vld [vmem:[#allocation2 + $0x408] sm:$0xff] }
  0x6d   :  { %1323 = vmatprep.subr.bf16.mxu0 %v2689_v6  ;;  %1405 = vmatprep.subr.bf16.mxu1 %v2691_v7  ;;  %v222_v3 = vld [vmem:[#allocation2 + $0x420] sm:$0xff]  ;;  %v223_v5 = vld [vmem:[#allocation2 + $0x428] sm:$0xff]  ;;  %v2744_v6 = vcombine.low %v210_v58, %v214_v59  ;;  %v2746_v7 = vcombine.low %v211_v60, %v215_v61 }
  0x6e   :  { %v2753_v8 = vcombine.high %v218_v2, %v222_v3  ;;  %v2755_v9 = vcombine.high %v219_v4, %v223_v5  ;;  %v226_v10 = vld [vmem:[#allocation2 + $0x440] sm:$0xff]  ;;  %v2752_v16 = vcombine.low %v218_v2, %v222_v3  ;;  %v2754_v17 = vcombine.low %v219_v4, %v223_v5 }
  0x6f   :  { %v230_v11 = vld [vmem:[#allocation2 + $0x460] sm:$0xff] }
  0x70   :  { %1324 = vmatpush1.bf16.msra.mxu0 %v2688_v12  ;;  %1406 = vmatpush1.bf16.msra.mxu1 %v2690_v13  ;;  %v3395_v12 = vcombine.low %v3385_v53, %v3385_v53  ;;  %v227_v13 = vld [vmem:[#allocation2 + $0x448] sm:$0xff]  ;;  %v2761_v18 = vcombine.high %v226_v10, %v230_v11  ;;  %v234_v19 = vld [vmem:[#allocation2 + $0x480] sm:$0xff]  ;;  %v2760_v24 = vcombine.low %v226_v10, %v230_v11  ;;  %v92_v11 = vld [vmem:[#allocation2 + $0x10] sm:$0xff] }
  0x71   :  { %1325 = vmatprep.subr.bf16.mxu0 %v2697_v14  ;;  %1407 = vmatprep.subr.bf16.mxu1 %v2699_v15  ;;  %v231_v14 = vld [vmem:[#allocation2 + $0x468] sm:$0xff]  ;;  %v242_v27 = vld [vmem:[#allocation2 + $0x4c0] sm:$0xff] }
  0x72   :  { %v3400_v15 = vld [vmem:[%s3479_s0 + $0x8] sm:$0xff]  ;;  %v2762_v25 = vcombine.low %v227_v13, %v231_v14  ;;  %v250_v33 = vld [vmem:[#allocation2 + $0x500] sm:$0xff] }
  0x73   :  { %v239_v53 = vld [vmem:[#allocation2 + $0x4a8] sm:$0xff]  ;;  %v254_v34 = vld [vmem:[#allocation2 + $0x520] sm:$0xff] }
  0x74   :  { %1326 = vmatpush1.bf16.msra.mxu0 %v2696_v20  ;;  %1408 = vmatpush1.bf16.msra.mxu1 %v2698_v21  ;;  %v238_v20 = vld [vmem:[#allocation2 + $0x4a0] sm:$0xff]  ;;  %v235_v21 = vld [vmem:[#allocation2 + $0x488] sm:$0xff]  ;;  %v2784_v48 = vcombine.low %v250_v33, %v254_v34 }
  0x75   :  { %1327 = vmatprep.subr.bf16.mxu0 %v2705_v22  ;;  %1409 = vmatprep.subr.bf16.mxu1 %v2707_v23  ;;  %v2763_v22 = vcombine.high %v227_v13, %v231_v14  ;;  %v3404_v23 = vcombine.high %v3400_v15, %v3400_v15  ;;  %v2769_v26 = vcombine.high %v234_v19, %v238_v20  ;;  %v258_v41 = vld [vmem:[#allocation2 + $0x540] sm:$0xff]  ;;  %v96_v13 = vld [vmem:[#allocation2 + $0x30] sm:$0xff] }
  0x76   :  { %v2768_v32 = vcombine.low %v234_v19, %v238_v20  ;;  %v2770_v35 = vcombine.low %v235_v21, %v239_v53  ;;  %v262_v42 = vld [vmem:[#allocation2 + $0x560] sm:$0xff] }
  0x77   :  { %v266_v49 = vld [vmem:[#allocation2 + $0x580] sm:$0xff]  ;;  %v2792_v58 = vcombine.low %v258_v41, %v262_v42 }
  0x78   :  { %1328 = vmatpush1.bf16.msra.mxu0 %v2704_v28  ;;  %1410 = vmatpush1.bf16.msra.mxu1 %v2706_v29  ;;  %v246_v28 = vld [vmem:[#allocation2 + $0x4e0] sm:$0xff]  ;;  %v243_v29 = vld [vmem:[#allocation2 + $0x4c8] sm:$0xff] }
  0x79   :  { %1329 = vmatprep.subr.bf16.mxu0 %v2713_v30  ;;  %1411 = vmatprep.subr.bf16.mxu1 %v2715_v31  ;;  %v2771_v30 = vcombine.high %v235_v21, %v239_v53  ;;  %v247_v31 = vld [vmem:[#allocation2 + $0x4e8] sm:$0xff]  ;;  %v2776_v40 = vcombine.low %v242_v27, %v246_v28  ;;  %v270_v50 = vld [vmem:[#allocation2 + $0x5a0] sm:$0xff]  ;;  %v100_v21 = vld [vmem:[#allocation2 + $0x50] sm:$0xff] }
  0x7a   :  { %v2778_v43 = vcombine.low %v243_v29, %v247_v31  ;;  %v274_v59 = vld [vmem:[#allocation2 + $0x5c0] sm:$0xff]  ;;  %v2800_v2 = vcombine.low %v266_v49, %v270_v50 }
  0x7b   :  { %v278_v60 = vld [vmem:[#allocation2 + $0x5e0] sm:$0xff] }
  0x7c   :  { %1330 = vmatpush1.bf16.msra.mxu0 %v2712_v36  ;;  %1412 = vmatpush1.bf16.msra.mxu1 %v2714_v37  ;;  %v2777_v36 = vcombine.high %v242_v27, %v246_v28  ;;  %v251_v37 = vld [vmem:[#allocation2 + $0x508] sm:$0xff]  ;;  %v282_v3 = vld [vmem:[#allocation2 + $0x600] sm:$0xff]  ;;  %v2808_v10 = vcombine.low %v274_v59, %v278_v60  ;;  %v3414_v28 = vcombine.low %v3400_v15, %v3400_v15  ;;  %v116_v15 = vld [vmem:[#allocation2 + $0xd0] sm:$0xff] }
  0x7d   :  { %1331 = vmatprep.subr.bf16.mxu0 %v2721_v38  ;;  %1413 = vmatprep.subr.bf16.mxu1 %v2723_v39  ;;  %v255_v38 = vld [vmem:[#allocation2 + $0x528] sm:$0xff]  ;;  %v2779_v39 = vcombine.high %v243_v29, %v247_v31  ;;  %v286_v4 = vld [vmem:[#allocation2 + $0x620] sm:$0xff]  ;;  %v2628_v29 = vcombine.low %v92_v11, %v96_v13  ;;  %v112_v31 = vld [vmem:[#allocation2 + $0xb0] sm:$0xff] }
  0x7e   :  { %v2786_v51 = vcombine.low %v251_v37, %v255_v38  ;;  %v2816_v20 = vcombine.low %v282_v3, %v286_v4 }
  0x80   :  { %1332 = vmatpush1.bf16.msra.mxu0 %v2720_v44  ;;  %1414 = vmatpush1.bf16.msra.mxu1 %v2722_v45  ;;  %v2785_v44 = vcombine.high %v250_v33, %v254_v34  ;;  %v259_v45 = vld [vmem:[#allocation2 + $0x548] sm:$0xff]  ;;  %v109_v34 = vld [vmem:[#allocation2 + $0x98] sm:$0xff] }
  0x81   :  { %1333 = vmatprep.subr.bf16.mxu0 %v2729_v46  ;;  %1415 = vmatprep.subr.bf16.mxu1 %v2731_v47  ;;  %v263_v46 = vld [vmem:[#allocation2 + $0x568] sm:$0xff]  ;;  %v2787_v47 = vcombine.high %v251_v37, %v255_v38  ;;  %v120_v38 = vld [vmem:[#allocation2 + $0xf0] sm:$0xff] }
  0x82   :  { %v2794_v61 = vcombine.low %v259_v45, %v263_v46 }
  0x84   :  { %1334 = vmatpush1.bf16.msra.mxu0 %v2728_v52  ;;  %1416 = vmatpush1.bf16.msra.mxu1 %v2730_v54  ;;  %v2793_v52 = vcombine.high %v258_v41, %v262_v42  ;;  %v267_v54 = vld [vmem:[#allocation2 + $0x588] sm:$0xff]  ;;  %v117_v41 = vld [vmem:[#allocation2 + $0xd8] sm:$0xff] }
  0x85   :  { %1335 = vmatprep.subr.bf16.mxu0 %v2737_v55  ;;  %1417 = vmatprep.subr.bf16.mxu1 %v2739_v56  ;;  %v271_v55 = vld [vmem:[#allocation2 + $0x5a8] sm:$0xff]  ;;  %v2795_v56 = vcombine.high %v259_v45, %v263_v46  ;;  %v121_v42 = vld [vmem:[#allocation2 + $0xf8] sm:$0xff]  ;;  %v124_v45 = vld [vmem:[#allocation2 + $0x110] sm:$0xff] }
  0x86   :  { %v2802_v5 = vcombine.low %v267_v54, %v271_v55  ;;  %v128_v46 = vld [vmem:[#allocation2 + $0x130] sm:$0xff] }
  0x88   :  { %1336 = vmatpush1.bf16.msra.mxu0 %v2736_v62  ;;  %1418 = vmatpush1.bf16.msra.mxu1 %v2738_v63  ;;  %v2801_v62 = vcombine.high %v266_v49, %v270_v50  ;;  %v275_v63 = vld [vmem:[#allocation2 + $0x5c8] sm:$0xff]  ;;  %v125_v49 = vld [vmem:[#allocation2 + $0x118] sm:$0xff] }
  0x89   :  { %1337 = vmatprep.subr.bf16.mxu0 %v2745_v0  ;;  %1419 = vmatprep.subr.bf16.mxu1 %v2747_v1  ;;  %v279_v0 = vld [vmem:[#allocation2 + $0x5e8] sm:$0xff]  ;;  %v2803_v1 = vcombine.high %v267_v54, %v271_v55  ;;  %v129_v50 = vld [vmem:[#allocation2 + $0x138] sm:$0xff]  ;;  %v132_v54 = vld [vmem:[#allocation2 + $0x150] sm:$0xff] }
  0x8a   :  { %v2810_v14 = vcombine.low %v275_v63, %v279_v0  ;;  %v136_v55 = vld [vmem:[#allocation2 + $0x170] sm:$0xff] }
  0x8c   :  { %1338 = vmatpush1.bf16.msra.mxu0 %v2744_v6  ;;  %1420 = vmatpush1.bf16.msra.mxu1 %v2746_v7  ;;  %v2809_v6 = vcombine.high %v274_v59, %v278_v60  ;;  %v283_v7 = vld [vmem:[#allocation2 + $0x608] sm:$0xff]  ;;  %v133_v59 = vld [vmem:[#allocation2 + $0x158] sm:$0xff] }
  0x8d   :  { %1348 = vmatprep.subr.bf16.mxu0 %v2753_v8  ;;  %1430 = vmatprep.subr.bf16.mxu1 %v2755_v9  ;;  %v287_v8 = vld [vmem:[#allocation2 + $0x628] sm:$0xff]  ;;  %v2811_v9 = vcombine.high %v275_v63, %v279_v0  ;;  %v137_v60 = vld [vmem:[#allocation2 + $0x178] sm:$0xff]  ;;  %v2669_v63 = vcombine.high %v132_v54, %v136_v55 }
  0x8e   :  { %v2819_v19 = vcombine.high %v283_v7, %v287_v8  ;;  %v2818_v53 = vcombine.low %v283_v7, %v287_v8  ;;  %v2671_v0 = vcombine.high %v133_v59, %v137_v60 }
  0x8f   :  { %1340 = vmatmul.mubr.bf16.vlgmr.msra.gmra.mrb[0].mxu0 %v3395_v12  ;;  %1422 = vmatmul.mubr.bf16.vlgmr.msra.gmra.mrb[0].mxu1 %v3395_v12 }
  0x90   :  { %1349 = vmatpush1.bf16.msra.mxu0 %v2752_v16  ;;  %1431 = vmatpush1.bf16.msra.mxu1 %v2754_v17  ;;  %v2817_v16 = vcombine.high %v282_v3, %v286_v4  ;;  %v93_v17 = vld [vmem:[#allocation2 + $0x18] sm:$0xff] }
  0x91   :  { %1350 = vmatprep.subr.bf16.mxu0 %v2761_v18  ;;  %1432 = vmatprep.subr.bf16.mxu1 %v2763_v22  ;;  %v97_v18 = vld [vmem:[#allocation2 + $0x38] sm:$0xff]  ;;  %v104_v22 = vld [vmem:[#allocation2 + $0x70] sm:$0xff] }
  0x92   :  { %2824 = vmatprep.mubr.msk.bf16.mxu0 %vm1303_vm0, %v3404_v23  ;;  %2825 = vmatprep.mubr.msk.bf16.mxu1 %vm1303_vm0, %v3404_v23  ;;  %v2631_v27 = vcombine.high %v93_v17, %v97_v18  ;;  %v2637_v33 = vcombine.high %v100_v21, %v104_v22  ;;  %v2636_v37 = vcombine.low %v100_v21, %v104_v22  ;;  %v141_v3 = vld [vmem:[#allocation2 + $0x198] sm:$0xff] }
  0x93   :  { %v145_v4 = vld [vmem:[#allocation2 + $0x1b8] sm:$0xff] }
  0x94   :  { %1351 = vmatpush1.bf16.msra.mxu0 %v2760_v24  ;;  %1433 = vmatpush1.bf16.msra.mxu1 %v2762_v25  ;;  %v2629_v24 = vcombine.high %v92_v11, %v96_v13  ;;  %v101_v25 = vld [vmem:[#allocation2 + $0x58] sm:$0xff]  ;;  %v2679_v8 = vcombine.high %v141_v3, %v145_v4 }
  0x95   :  { %1352 = vmatprep.subr.bf16.mxu0 %v2769_v26  ;;  %1434 = vmatprep.subr.bf16.mxu1 %v2771_v30  ;;  %v105_v26 = vld [vmem:[#allocation2 + $0x78] sm:$0xff]  ;;  %v108_v30 = vld [vmem:[#allocation2 + $0x90] sm:$0xff] }
  0x96   :  { %v149_v11 = vld [vmem:[#allocation2 + $0x1d8] sm:$0xff] }
  0x97   :  { %v153_v13 = vld [vmem:[#allocation2 + $0x1f8] sm:$0xff] }
  0x98   :  { %1353 = vmatpush1.bf16.msra.mxu0 %v2768_v32  ;;  %1435 = vmatpush1.bf16.msra.mxu1 %v2770_v35  ;;  %v2630_v32 = vcombine.low %v93_v17, %v97_v18  ;;  %v113_v35 = vld [vmem:[#allocation2 + $0xb8] sm:$0xff]  ;;  %v2687_v18 = vcombine.high %v149_v11, %v153_v13 }
  0x99   :  { %1354 = vmatprep.subr.bf16.mxu0 %v2777_v36  ;;  %1436 = vmatprep.subr.bf16.mxu1 %v2779_v39  ;;  %v2639_v36 = vcombine.high %v101_v25, %v105_v26  ;;  %v2638_v39 = vcombine.low %v101_v25, %v105_v26  ;;  %v157_v21 = vld [vmem:[#allocation2 + $0x218] sm:$0xff] }
  0x9a   :  { %v161_v22 = vld [vmem:[#allocation2 + $0x238] sm:$0xff] }
  0x9b   :  { %v2695_v26 = vcombine.high %v157_v21, %v161_v22 }
  0x9c   :  { %1355 = vmatpush1.bf16.msra.mxu0 %v2776_v40  ;;  %1437 = vmatpush1.bf16.msra.mxu1 %v2778_v43  ;;  %v2645_v40 = vcombine.high %v108_v30, %v112_v31  ;;  %v2647_v43 = vcombine.high %v109_v34, %v113_v35 }
  0x9d   :  { %1356 = vmatprep.subr.bf16.mxu0 %v2785_v44  ;;  %1438 = vmatprep.subr.bf16.mxu1 %v2787_v47  ;;  %v2644_v44 = vcombine.low %v108_v30, %v112_v31  ;;  %v2646_v47 = vcombine.low %v109_v34, %v113_v35  ;;  %v165_v30 = vld [vmem:[#allocation2 + $0x258] sm:$0xff] }
  0x9e   :  { %v169_v31 = vld [vmem:[#allocation2 + $0x278] sm:$0xff] }
  0x9f   :  { %v2703_v35 = vcombine.high %v165_v30, %v169_v31 }
  0xa0   :  { %1357 = vmatpush1.bf16.msra.mxu0 %v2784_v48  ;;  %1439 = vmatpush1.bf16.msra.mxu1 %v2786_v51  ;;  %v2653_v48 = vcombine.high %v116_v15, %v120_v38  ;;  %v2655_v51 = vcombine.high %v117_v41, %v121_v42 }
  0xa1   :  { %1358 = vmatprep.subr.bf16.mxu0 %v2793_v52  ;;  %1440 = vmatprep.subr.bf16.mxu1 %v2795_v56  ;;  %v2652_v52 = vcombine.low %v116_v15, %v120_v38  ;;  %v2654_v56 = vcombine.low %v117_v41, %v121_v42  ;;  %v173_v15 = vld [vmem:[#allocation2 + $0x298] sm:$0xff] }
  0xa2   :  { %v177_v38 = vld [vmem:[#allocation2 + $0x2b8] sm:$0xff] }
  0xa3   :  { %v2711_v42 = vcombine.high %v173_v15, %v177_v38 }
  0xa4   :  { %1359 = vmatpush1.bf16.msra.mxu0 %v2792_v58  ;;  %1441 = vmatpush1.bf16.msra.mxu1 %v2794_v61  ;;  %v2663_v58 = vcombine.high %v125_v49, %v129_v50  ;;  %v2660_v61 = vcombine.low %v124_v45, %v128_v46 }
  0xa5   :  { %1360 = vmatprep.subr.bf16.mxu0 %v2801_v62  ;;  %1442 = vmatprep.subr.bf16.mxu1 %v2803_v1  ;;  %v2662_v62 = vcombine.low %v125_v49, %v129_v50  ;;  %v140_v1 = vld [vmem:[#allocation2 + $0x190] sm:$0xff] }
  0xa8   :  { %1361 = vmatpush1.bf16.msra.mxu0 %v2800_v2  ;;  %1443 = vmatpush1.bf16.msra.mxu1 %v2802_v5  ;;  %v144_v2 = vld [vmem:[#allocation2 + $0x1b0] sm:$0xff]  ;;  %v2668_v5 = vcombine.low %v132_v54, %v136_v55  ;;  %v189_v54 = vld [vmem:[#allocation2 + $0x318] sm:$0xff] }
  0xa9   :  { %1362 = vmatprep.subr.bf16.mxu0 %v2809_v6  ;;  %1444 = vmatprep.subr.bf16.mxu1 %v2811_v9  ;;  %v2670_v6 = vcombine.low %v133_v59, %v137_v60  ;;  %v2677_v7 = vcombine.high %v140_v1, %v144_v2  ;;  %v148_v9 = vld [vmem:[#allocation2 + $0x1d0] sm:$0xff]  ;;  %v193_v55 = vld [vmem:[#allocation2 + $0x338] sm:$0xff] }
  0xaa   :  { %v2727_v59 = vcombine.high %v189_v54, %v193_v55  ;;  %v196_v60 = vld [vmem:[#allocation2 + $0x350] sm:$0xff] }
  0xac   :  { %1363 = vmatpush1.bf16.msra.mxu0 %v2808_v10  ;;  %1445 = vmatpush1.bf16.msra.mxu1 %v2810_v14  ;;  %v152_v10 = vld [vmem:[#allocation2 + $0x1f0] sm:$0xff]  ;;  %v2676_v14 = vcombine.low %v140_v1, %v144_v2  ;;  %v2726_v1 = vcombine.low %v189_v54, %v193_v55 }
  0xad   :  { %1364 = vmatprep.subr.bf16.mxu0 %v2817_v16  ;;  %1446 = vmatprep.subr.bf16.mxu1 %v2819_v19  ;;  %v2678_v16 = vcombine.low %v141_v3, %v145_v4  ;;  %v2685_v17 = vcombine.high %v148_v9, %v152_v10  ;;  %v156_v19 = vld [vmem:[#allocation2 + $0x210] sm:$0xff] }
  0xae   :  { %v204_v4 = vld [vmem:[#allocation2 + $0x390] sm:$0xff] }
  0xaf   :  { %v252_v54 = vld [vmem:[#allocation2 + $0x510] sm:$0xff] }
  0xb0   :  { %1365 = vmatpush1.bf16.msra.mxu0 %v2816_v20  ;;  %1447 = vmatpush1.bf16.msra.mxu1 %v2818_v53  ;;  %v160_v20 = vld [vmem:[#allocation2 + $0x230] sm:$0xff]  ;;  %v2684_v53 = vcombine.low %v148_v9, %v152_v10 }
  0xb1   :  { %1471 = vmatprep.subr.bf16.mxu0 %v2629_v24  ;;  %1553 = vmatprep.subr.bf16.mxu1 %v2631_v27  ;;  %v2686_v24 = vcombine.low %v149_v11, %v153_v13  ;;  %v2693_v25 = vcombine.high %v156_v19, %v160_v20  ;;  %v164_v27 = vld [vmem:[#allocation2 + $0x250] sm:$0xff] }
  0xb2   :  { %v212_v13 = vld [vmem:[#allocation2 + $0x3d0] sm:$0xff] }
  0xb3   :  { %1381 = vmatmul.mubr.bf16.vlgmr.msra.gmra.mrb[0].mxu0 %v3414_v28  ;;  %1463 = vmatmul.mubr.bf16.vlgmr.msra.gmra.mrb[0].mxu1 %v3414_v28  ;;  %v256_v55 = vld [vmem:[#allocation2 + $0x530] sm:$0xff] }
  0xb4   :  { %1472 = vmatpush1.bf16.msra.mxu0 %v2628_v29  ;;  %1554 = vmatpush1.bf16.msra.mxu1 %v2630_v32  ;;  %v168_v29 = vld [vmem:[#allocation2 + $0x270] sm:$0xff]  ;;  %v2692_v32 = vcombine.low %v156_v19, %v160_v20 }
  0xb5   :  { %1473 = vmatprep.subr.bf16.mxu0 %v2637_v33  ;;  %1555 = vmatprep.subr.bf16.mxu1 %v2639_v36  ;;  %v2694_v33 = vcombine.low %v157_v21, %v161_v22  ;;  %v2701_v34 = vcombine.high %v164_v27, %v168_v29  ;;  %v172_v36 = vld [vmem:[#allocation2 + $0x290] sm:$0xff] }
  0xb6   :  { %1503 = vmatprep.mubr.bf16.mxu0 %v3389_v57  ;;  %1585 = vmatprep.mubr.bf16.mxu1 %v3389_v57  ;;  %v2661_v57 = vcombine.high %v124_v45, %v128_v46  ;;  %v181_v45 = vld [vmem:[#allocation2 + $0x2d8] sm:$0xff]  ;;  %v220_v22 = vld [vmem:[#allocation2 + $0x410] sm:$0xff] }
  0xb7   :  { %v185_v46 = vld [vmem:[#allocation2 + $0x2f8] sm:$0xff] }
  0xb8   :  { %1474 = vmatpush1.bf16.msra.mxu0 %v2636_v37  ;;  %1556 = vmatpush1.bf16.msra.mxu1 %v2638_v39  ;;  %v176_v37 = vld [vmem:[#allocation2 + $0x2b0] sm:$0xff]  ;;  %v2700_v39 = vcombine.low %v164_v27, %v168_v29  ;;  %v2719_v50 = vcombine.high %v181_v45, %v185_v46 }
  0xb9   :  { %1475 = vmatprep.subr.bf16.mxu0 %v2645_v40  ;;  %1557 = vmatprep.subr.bf16.mxu1 %v2647_v43  ;;  %v2702_v40 = vcombine.low %v165_v30, %v169_v31  ;;  %v2709_v41 = vcombine.high %v172_v36, %v176_v37  ;;  %v180_v43 = vld [vmem:[#allocation2 + $0x2d0] sm:$0xff] }
  0xba   :  { %v228_v31 = vld [vmem:[#allocation2 + $0x450] sm:$0xff] }
  0xbc   :  { %1476 = vmatpush1.bf16.msra.mxu0 %v2644_v44  ;;  %1558 = vmatpush1.bf16.msra.mxu1 %v2646_v47  ;;  %v184_v44 = vld [vmem:[#allocation2 + $0x2f0] sm:$0xff]  ;;  %v2708_v47 = vcombine.low %v172_v36, %v176_v37 }
  0xbd   :  { %1477 = vmatprep.subr.bf16.mxu0 %v2653_v48  ;;  %1559 = vmatprep.subr.bf16.mxu1 %v2655_v51  ;;  %v2710_v48 = vcombine.low %v173_v15, %v177_v38  ;;  %v2717_v49 = vcombine.high %v180_v43, %v184_v44  ;;  %v188_v51 = vld [vmem:[#allocation2 + $0x310] sm:$0xff] }
  0xbe   :  { %v236_v38 = vld [vmem:[#allocation2 + $0x490] sm:$0xff] }
  0xc0   :  { %1478 = vmatpush1.bf16.msra.mxu0 %v2652_v52  ;;  %1560 = vmatpush1.bf16.msra.mxu1 %v2654_v56  ;;  %v192_v52 = vld [vmem:[#allocation2 + $0x330] sm:$0xff]  ;;  %v2716_v56 = vcombine.low %v180_v43, %v184_v44 }
  0xc1   :  { %1479 = vmatprep.subr.bf16.mxu0 %v2661_v57  ;;  %1561 = vmatprep.subr.bf16.mxu1 %v2663_v58  ;;  %v2718_v57 = vcombine.low %v181_v45, %v185_v46  ;;  %v2725_v58 = vcombine.high %v188_v51, %v192_v52  ;;  %v244_v46 = vld [vmem:[#allocation2 + $0x4d0] sm:$0xff] }
  0xc4   :  { %1480 = vmatpush1.bf16.msra.mxu0 %v2660_v61  ;;  %1562 = vmatpush1.bf16.msra.mxu1 %v2662_v62  ;;  %v200_v61 = vld [vmem:[#allocation2 + $0x370] sm:$0xff]  ;;  %v197_v62 = vld [vmem:[#allocation2 + $0x358] sm:$0xff] }
  0xc5   :  { %1481 = vmatprep.subr.bf16.mxu0 %v2669_v63  ;;  %1563 = vmatprep.subr.bf16.mxu1 %v2671_v0  ;;  %v201_v63 = vld [vmem:[#allocation2 + $0x378] sm:$0xff]  ;;  %v2724_v0 = vcombine.low %v188_v51, %v192_v52  ;;  %v2733_v2 = vcombine.high %v196_v60, %v200_v61 }
  0xc6   :  { %v2735_v3 = vcombine.high %v197_v62, %v201_v63  ;;  %v2734_v9 = vcombine.low %v197_v62, %v201_v63  ;;  %v264_v62 = vld [vmem:[#allocation2 + $0x570] sm:$0xff]  ;;  %v261_v63 = vld [vmem:[#allocation2 + $0x558] sm:$0xff] }
  0xc8   :  { %1482 = vmatpush1.bf16.msra.mxu0 %v2668_v5  ;;  %1564 = vmatpush1.bf16.msra.mxu1 %v2670_v6  ;;  %v208_v5 = vld [vmem:[#allocation2 + $0x3b0] sm:$0xff]  ;;  %v205_v6 = vld [vmem:[#allocation2 + $0x398] sm:$0xff] }
  0xc9   :  { %1483 = vmatprep.subr.bf16.mxu0 %v2677_v7  ;;  %1565 = vmatprep.subr.bf16.mxu1 %v2679_v8  ;;  %v209_v7 = vld [vmem:[#allocation2 + $0x3b8] sm:$0xff]  ;;  %v2732_v8 = vcombine.low %v196_v60, %v200_v61  ;;  %v2741_v10 = vcombine.high %v204_v4, %v208_v5  ;;  %v2789_v60 = vcombine.high %v252_v54, %v256_v55  ;;  %v260_v61 = vld [vmem:[#allocation2 + $0x550] sm:$0xff] }
  0xca   :  { %v2743_v11 = vcombine.high %v205_v6, %v209_v7  ;;  %v2742_v19 = vcombine.low %v205_v6, %v209_v7  ;;  %v272_v6 = vld [vmem:[#allocation2 + $0x5b0] sm:$0xff]  ;;  %v269_v7 = vld [vmem:[#allocation2 + $0x598] sm:$0xff] }
  0xcc   :  { %1484 = vmatpush1.bf16.msra.mxu0 %v2676_v14  ;;  %1566 = vmatpush1.bf16.msra.mxu1 %v2678_v16  ;;  %v216_v14 = vld [vmem:[#allocation2 + $0x3f0] sm:$0xff]  ;;  %v213_v16 = vld [vmem:[#allocation2 + $0x3d8] sm:$0xff] }
  0xcd   :  { %1485 = vmatprep.subr.bf16.mxu0 %v2685_v17  ;;  %1567 = vmatprep.subr.bf16.mxu1 %v2687_v18  ;;  %v217_v17 = vld [vmem:[#allocation2 + $0x3f8] sm:$0xff]  ;;  %v2740_v18 = vcombine.low %v204_v4, %v208_v5  ;;  %v2749_v20 = vcombine.high %v212_v13, %v216_v14  ;;  %v268_v5 = vld [vmem:[#allocation2 + $0x590] sm:$0xff] }
  0xce   :  { %v2751_v21 = vcombine.high %v213_v16, %v217_v17  ;;  %v2750_v27 = vcombine.low %v213_v16, %v217_v17  ;;  %v280_v16 = vld [vmem:[#allocation2 + $0x5f0] sm:$0xff]  ;;  %v277_v17 = vld [vmem:[#allocation2 + $0x5d8] sm:$0xff] }
  0xd0   :  { %1486 = vmatpush1.bf16.msra.mxu0 %v2684_v53  ;;  %1568 = vmatpush1.bf16.msra.mxu1 %v2686_v24  ;;  %v224_v53 = vld [vmem:[#allocation2 + $0x430] sm:$0xff]  ;;  %v221_v24 = vld [vmem:[#allocation2 + $0x418] sm:$0xff] }
  0xd1   :  { %1487 = vmatprep.subr.bf16.mxu0 %v2693_v25  ;;  %1569 = vmatprep.subr.bf16.mxu1 %v2695_v26  ;;  %v225_v25 = vld [vmem:[#allocation2 + $0x438] sm:$0xff]  ;;  %v2748_v26 = vcombine.low %v212_v13, %v216_v14  ;;  %v2757_v29 = vcombine.high %v220_v22, %v224_v53  ;;  %v276_v14 = vld [vmem:[#allocation2 + $0x5d0] sm:$0xff] }
  0xd2   :  { %v2759_v30 = vcombine.high %v221_v24, %v225_v25  ;;  %v2758_v36 = vcombine.low %v221_v24, %v225_v25  ;;  %v288_v24 = vld [vmem:[#allocation2 + $0x630] sm:$0xff]  ;;  %v285_v25 = vld [vmem:[#allocation2 + $0x618] sm:$0xff] }
  0xd4   :  { %1488 = vmatpush1.bf16.msra.mxu0 %v2692_v32  ;;  %1570 = vmatpush1.bf16.msra.mxu1 %v2694_v33  ;;  %v232_v32 = vld [vmem:[#allocation2 + $0x470] sm:$0xff]  ;;  %v229_v33 = vld [vmem:[#allocation2 + $0x458] sm:$0xff] }
  0xd5   :  { %1489 = vmatprep.subr.bf16.mxu0 %v2701_v34  ;;  %1571 = vmatprep.subr.bf16.mxu1 %v2703_v35  ;;  %v233_v34 = vld [vmem:[#allocation2 + $0x478] sm:$0xff]  ;;  %v2756_v35 = vcombine.low %v220_v22, %v224_v53  ;;  %v2765_v37 = vcombine.high %v228_v31, %v232_v32  ;;  %v284_v53 = vld [vmem:[#allocation2 + $0x610] sm:$0xff] }
  0xd6   :  { %v2767_v15 = vcombine.high %v229_v33, %v233_v34  ;;  %v2766_v43 = vcombine.low %v229_v33, %v233_v34  ;;  %v3042_v34 = vld [vmem:[#allocation4 + $0x4] ss:$8 sps:$4 sm:$0xff]  }
  0xd8   :  { %1490 = vmatpush1.bf16.msra.mxu0 %v2700_v39  ;;  %1572 = vmatpush1.bf16.msra.mxu1 %v2702_v40  ;;  %v240_v39 = vld [vmem:[#allocation2 + $0x4b0] sm:$0xff]  ;;  %v237_v40 = vld [vmem:[#allocation2 + $0x498] sm:$0xff] }
  0xd9   :  { %1491 = vmatprep.subr.bf16.mxu0 %v2709_v41  ;;  %1573 = vmatprep.subr.bf16.mxu1 %v2711_v42  ;;  %v241_v41 = vld [vmem:[#allocation2 + $0x4b8] sm:$0xff]  ;;  %v2764_v42 = vcombine.low %v228_v31, %v232_v32  ;;  %v2773_v44 = vcombine.high %v236_v38, %v240_v39  ;;  %v2820_v32 = vcombine.low %v284_v53, %v288_v24 }
  0xda   :  { %v2775_v45 = vcombine.high %v237_v40, %v241_v41 }
  0xdc   :  { %1492 = vmatpush1.bf16.msra.mxu0 %v2708_v47  ;;  %1574 = vmatpush1.bf16.msra.mxu1 %v2710_v48  ;;  %v248_v47 = vld [vmem:[#allocation2 + $0x4f0] sm:$0xff]  ;;  %v245_v48 = vld [vmem:[#allocation2 + $0x4d8] sm:$0xff] }
  0xdd   :  { %1493 = vmatprep.subr.bf16.mxu0 %v2717_v49  ;;  %1575 = vmatprep.subr.bf16.mxu1 %v2719_v50  ;;  %v249_v49 = vld [vmem:[#allocation2 + $0x4f8] sm:$0xff]  ;;  %v2772_v50 = vcombine.low %v236_v38, %v240_v39  ;;  %v2781_v51 = vcombine.high %v244_v46, %v248_v47  ;;  %v3046_v38 = vld [vmem:[#allocation4 + $0x20] ss:$8 sps:$4 sm:$0xff]  }
  0xde   :  { %v2783_v52 = vcombine.high %v245_v48, %v249_v49  ;;  %v3051_v39 = vld [vmem:[#allocation4 + $0x34] ss:$8 sps:$4 sm:$0xff]  }
  0xe0   :  { %1494 = vmatpush1.bf16.msra.mxu0 %v2716_v56  ;;  %1576 = vmatpush1.bf16.msra.mxu1 %v2718_v57  ;;  %v253_v56 = vld [vmem:[#allocation2 + $0x518] sm:$0xff] }
  0xe1   :  { %1495 = vmatprep.subr.bf16.mxu0 %v2725_v58  ;;  %1577 = vmatprep.subr.bf16.mxu1 %v2727_v59  ;;  %v257_v57 = vld [vmem:[#allocation2 + $0x538] sm:$0xff]  ;;  %v2780_v58 = vcombine.low %v244_v46, %v248_v47  ;;  %v2782_v59 = vcombine.low %v245_v48, %v249_v49  ;;  %v3066_v48 = vld [vmem:[#allocation4 + $0x84] ss:$8 sps:$4 sm:$0xff]   ;;  %v3064_v49 = vld [vmem:[#allocation4 + $0x80] ss:$8 sps:$4 sm:$0xff]  }
  0xe2   :  { %v3063_v46 = vld [vmem:[#allocation4 + $0x74] ss:$8 sps:$4 sm:$0xff]   ;;  %v3061_v47 = vld [vmem:[#allocation4 + $0x70] ss:$8 sps:$4 sm:$0xff]  }
  0xe4   :  { %1496 = vmatpush1.bf16.msra.mxu0 %v2724_v0  ;;  %1578 = vmatpush1.bf16.msra.mxu1 %v2726_v1  ;;  %v265_v0 = vld [vmem:[#allocation2 + $0x578] sm:$0xff]  ;;  %v2788_v1 = vcombine.low %v252_v54, %v256_v55 }
  0xe5   :  { %1497 = vmatprep.subr.bf16.mxu0 %v2733_v2  ;;  %1579 = vmatprep.subr.bf16.mxu1 %v2735_v3  ;;  %v2790_v2 = vcombine.low %v253_v56, %v257_v57  ;;  %v2797_v3 = vcombine.high %v260_v61, %v264_v62  ;;  %v2799_v4 = vcombine.high %v261_v63, %v265_v0  ;;  %v3075_v54 = vld [vmem:[#allocation4 + $0xb4] ss:$8 sps:$4 sm:$0xff]   ;;  %v3073_v55 = vld [vmem:[#allocation4 + $0xb0] ss:$8 sps:$4 sm:$0xff]  }
  0xe8   :  { %1498 = vmatpush1.bf16.msra.mxu0 %v2732_v8  ;;  %1580 = vmatpush1.bf16.msra.mxu1 %v2734_v9  ;;  %v273_v8 = vld [vmem:[#allocation2 + $0x5b8] sm:$0xff]  ;;  %v2796_v9 = vcombine.low %v260_v61, %v264_v62 }
  0xe9   :  { %1499 = vmatprep.subr.bf16.mxu0 %v2741_v10  ;;  %1581 = vmatprep.subr.bf16.mxu1 %v2743_v11  ;;  %v2798_v10 = vcombine.low %v261_v63, %v265_v0  ;;  %v2805_v11 = vcombine.high %v268_v5, %v272_v6  ;;  %v2807_v13 = vcombine.high %v269_v7, %v273_v8  ;;  %v3087_v61 = vld [vmem:[#allocation4 + $0xf4] ss:$8 sps:$4 sm:$0xff]   ;;  %v3085_v62 = vld [vmem:[#allocation4 + $0xf0] ss:$8 sps:$4 sm:$0xff]   ;;  %v3088_v63 = vld [vmem:[#allocation6] ss:$12 sps:$4 sm:$0xff]  }
  0xea   :  { %v3090_v0 = vld [vmem:[#allocation6 + $0x4] ss:$12 sps:$4 sm:$0xff]  }
  0xec   :  { %1500 = vmatpush1.bf16.msra.mxu0 %v2740_v18  ;;  %1582 = vmatpush1.bf16.msra.mxu1 %v2742_v19  ;;  %v281_v18 = vld [vmem:[#allocation2 + $0x5f8] sm:$0xff]  ;;  %v2804_v19 = vcombine.low %v268_v5, %v272_v6 }
  0xed   :  { %1501 = vmatprep.subr.bf16.mxu0 %v2749_v20  ;;  %1583 = vmatprep.subr.bf16.mxu1 %v2751_v21  ;;  %v2806_v20 = vcombine.low %v269_v7, %v273_v8  ;;  %v2813_v21 = vcombine.high %v276_v14, %v280_v16  ;;  %v2815_v22 = vcombine.high %v277_v17, %v281_v18  ;;  %v3094_v5 = vld [vmem:[#allocation6 + $0x30] ss:$12 sps:$4 sm:$0xff]   ;;  %v3099_v6 = vld [vmem:[#allocation6 + $0x4c] ss:$12 sps:$4 sm:$0xff]   ;;  %v3097_v7 = vld [vmem:[#allocation6 + $0x48] ss:$12 sps:$4 sm:$0xff]  }
  0xee   :  { %v3102_v8 = vld [vmem:[#allocation6 + $0x64] ss:$12 sps:$4 sm:$0xff]  }
  0xf0   :  { %1502 = vmatpush1.bf16.msra.mxu0 %v2748_v26  ;;  %1584 = vmatpush1.bf16.msra.mxu1 %v2750_v27  ;;  %v289_v26 = vld [vmem:[#allocation2 + $0x638] sm:$0xff]  ;;  %v2812_v27 = vcombine.low %v276_v14, %v280_v16 }
  0xf1   :  { %1512 = vmatprep.subr.bf16.mxu0 %v2757_v29  ;;  %1594 = vmatprep.subr.bf16.mxu1 %v2759_v30  ;;  %v2814_v29 = vcombine.low %v277_v17, %v281_v18  ;;  %v2821_v30 = vcombine.high %v284_v53, %v288_v24  ;;  %v2823_v31 = vcombine.high %v285_v25, %v289_v26  ;;  %v3105_v18 = vld [vmem:[#allocation6 + $0x7c] ss:$12 sps:$4 sm:$0xff]   ;;  %v3103_v53 = vld [vmem:[#allocation6 + $0x78] ss:$12 sps:$4 sm:$0xff]   ;;  %v3108_v24 = vld [vmem:[#allocation6 + $0x94] ss:$12 sps:$4 sm:$0xff]  }
  0xf2   :  { %v2822_v33 = vcombine.low %v285_v25, %v289_v26  ;;  %v3106_v25 = vld [vmem:[#allocation6 + $0x90] ss:$12 sps:$4 sm:$0xff]   ;;  %v3111_v26 = vld [vmem:[#allocation6 + $0xac] ss:$12 sps:$4 sm:$0xff]  }
  0xf3   :  { %1504 = vmatmul.mubr.bf16.vlgmr.msra.gmra.mrb[4].mxu0 %v3395_v12  ;;  %1586 = vmatmul.mubr.bf16.vlgmr.msra.gmra.mrb[4].mxu1 %v3395_v12  ;;  %v2774_v12 = vcombine.low %v237_v40, %v241_v41  ;;  %v3049_v40 = vld [vmem:[#allocation4 + $0x30] ss:$8 sps:$4 sm:$0xff]   ;;  %v3054_v41 = vld [vmem:[#allocation4 + $0x44] ss:$8 sps:$4 sm:$0xff]  }
  0xf4   :  { %1513 = vmatpush1.bf16.msra.mxu0 %v2756_v35  ;;  %1595 = vmatpush1.bf16.msra.mxu1 %v2758_v36  ;;  %v3040_v35 = vld [vmem:[#allocation4] ss:$8 sps:$4 sm:$0xff]   ;;  %v3045_v36 = vld [vmem:[#allocation4 + $0x14] ss:$8 sps:$4 sm:$0xff]  }
  0xf5   :  { %1514 = vmatprep.subr.bf16.mxu0 %v2765_v37  ;;  %1596 = vmatprep.subr.bf16.mxu1 %v2767_v15  ;;  %v3043_v37 = vld [vmem:[#allocation4 + $0x10] ss:$8 sps:$4 sm:$0xff]   ;;  %v3048_v15 = vld [vmem:[#allocation4 + $0x24] ss:$8 sps:$4 sm:$0xff]  }
  0xf6   :  { %2826 = vmatprep.mubr.msk.bf16.mxu0 %vm1303_vm0, %v3404_v23  ;;  %2827 = vmatprep.mubr.msk.bf16.mxu1 %vm1303_vm0, %v3404_v23  ;;  %v2791_v23 = vcombine.high %v253_v56, %v257_v57  ;;  %v3078_v56 = vld [vmem:[#allocation4 + $0xc4] ss:$8 sps:$4 sm:$0xff]   ;;  %v3076_v57 = vld [vmem:[#allocation4 + $0xc0] ss:$8 sps:$4 sm:$0xff]  }
  0xf8   :  { %1515 = vmatpush1.bf16.msra.mxu0 %v2764_v42  ;;  %1597 = vmatpush1.bf16.msra.mxu1 %v2766_v43  ;;  %v3052_v42 = vld [vmem:[#allocation4 + $0x40] ss:$8 sps:$4 sm:$0xff]   ;;  %v3057_v43 = vld [vmem:[#allocation4 + $0x54] ss:$8 sps:$4 sm:$0xff]  }
  0xf9   :  { %1516 = vmatprep.subr.bf16.mxu0 %v2773_v44  ;;  %1598 = vmatprep.subr.bf16.mxu1 %v2775_v45  ;;  %v3055_v44 = vld [vmem:[#allocation4 + $0x50] ss:$8 sps:$4 sm:$0xff]   ;;  %v3058_v45 = vld [vmem:[#allocation4 + $0x60] ss:$8 sps:$4 sm:$0xff]  }
  0xfc   :  { %1517 = vmatpush1.bf16.msra.mxu0 %v2772_v50  ;;  %1599 = vmatpush1.bf16.msra.mxu1 %v2774_v12  ;;  %v3069_v50 = vld [vmem:[#allocation4 + $0x94] ss:$8 sps:$4 sm:$0xff]   ;;  %v3067_v12 = vld [vmem:[#allocation4 + $0x90] ss:$8 sps:$4 sm:$0xff]  }
  0xfd   :  { %1518 = vmatprep.subr.bf16.mxu0 %v2781_v51  ;;  %1600 = vmatprep.subr.bf16.mxu1 %v2783_v52  ;;  %v3072_v51 = vld [vmem:[#allocation4 + $0xa4] ss:$8 sps:$4 sm:$0xff]   ;;  %v3070_v52 = vld [vmem:[#allocation4 + $0xa0] ss:$8 sps:$4 sm:$0xff]  }
 0x100   :  { %1519 = vmatpush1.bf16.msra.mxu0 %v2780_v58  ;;  %1601 = vmatpush1.bf16.msra.mxu1 %v2782_v59  ;;  %v3081_v58 = vld [vmem:[#allocation4 + $0xd4] ss:$8 sps:$4 sm:$0xff]   ;;  %v3079_v59 = vld [vmem:[#allocation4 + $0xd0] ss:$8 sps:$4 sm:$0xff]  }
 0x101   :  { %1520 = vmatprep.subr.bf16.mxu0 %v2789_v60  ;;  %1602 = vmatprep.subr.bf16.mxu1 %v2791_v23  ;;  %v3084_v60 = vld [vmem:[#allocation4 + $0xe4] ss:$8 sps:$4 sm:$0xff]   ;;  %v3082_v23 = vld [vmem:[#allocation4 + $0xe0] ss:$8 sps:$4 sm:$0xff]  }
 0x104   :  { %1521 = vmatpush1.bf16.msra.mxu0 %v2788_v1  ;;  %1603 = vmatpush1.bf16.msra.mxu1 %v2790_v2  ;;  %v3093_v1 = vld [vmem:[#allocation6 + $0x1c] ss:$12 sps:$4 sm:$0xff]   ;;  %v3091_v2 = vld [vmem:[#allocation6 + $0x18] ss:$12 sps:$4 sm:$0xff]  }
 0x105   :  { %1522 = vmatprep.subr.bf16.mxu0 %v2797_v3  ;;  %1604 = vmatprep.subr.bf16.mxu1 %v2799_v4  ;;  %v3096_v3 = vld [vmem:[#allocation6 + $0x34] ss:$12 sps:$4 sm:$0xff]  }
 0x106   :  { %v3115_v4 = vld [vmem:[#allocation6 + $0xc8] ss:$12 sps:$4 sm:$0xff]  }
 0x108   :  { %1523 = vmatpush1.bf16.msra.mxu0 %v2796_v9  ;;  %1605 = vmatpush1.bf16.msra.mxu1 %v2798_v10 }
 0x109   :  { %1524 = vmatprep.subr.bf16.mxu0 %v2805_v11  ;;  %1606 = vmatprep.subr.bf16.mxu1 %v2807_v13  ;;  %v3100_v13 = vld [vmem:[#allocation6 + $0x60] ss:$12 sps:$4 sm:$0xff]  }
 0x10c   :  { %1525 = vmatpush1.bf16.msra.mxu0 %v2804_v19  ;;  %1607 = vmatpush1.bf16.msra.mxu1 %v2806_v20 }
 0x10d   :  { %1526 = vmatprep.subr.bf16.mxu0 %v2813_v21  ;;  %1608 = vmatprep.subr.bf16.mxu1 %v2815_v22 }
 0x110   :  { %1527 = vmatpush1.bf16.msra.mxu0 %v2812_v27  ;;  %1609 = vmatpush1.bf16.msra.mxu1 %v2814_v29  ;;  %v3109_v27 = vld [vmem:[#allocation6 + $0xa8] ss:$12 sps:$4 sm:$0xff]   ;;  %v3114_v29 = vld [vmem:[#allocation6 + $0xc4] ss:$12 sps:$4 sm:$0xff]  }
 0x111   :  { %1528 = vmatprep.subr.bf16.mxu0 %v2821_v30  ;;  %1610 = vmatprep.subr.bf16.mxu1 %v2823_v31  ;;  %v3112_v30 = vld [vmem:[#allocation6 + $0xc0] ss:$12 sps:$4 sm:$0xff]   ;;  %v3119_v31 = vld [vmem:[#allocation6 + $0xdc] ss:$12 sps:$4 sm:$0xff]  }
 0x114   :  { %1529 = vmatpush1.bf16.msra.mxu0 %v2820_v32  ;;  %1611 = vmatpush1.bf16.msra.mxu1 %v2822_v33  ;;  %v3117_v32 = vld [vmem:[#allocation6 + $0xd8] ss:$12 sps:$4 sm:$0xff]   ;;  %v3124_v33 = vld [vmem:[#allocation6 + $0xf4] ss:$12 sps:$4 sm:$0xff]  }
 0x115   :  { %1863 = vmatprep.subr.bf16.mxu0 %v3042_v34  ;;  %2245 = vmatprep.subr.bf16.mxu1 %v3090_v0  ;;  %v3122_v34 = vld [vmem:[#allocation6 + $0xf0] ss:$12 sps:$4 sm:$0xff]   ;;  %v3120_v0 = vld [vmem:[#allocation6 + $0xe0] ss:$12 sps:$4 sm:$0xff]  }
 0x117   :  { %1545 = vmatmul.mubr.bf16.vlgmr.msra.gmra.mrb[4].mxu0 %v3414_v28  ;;  %1627 = vmatmul.mubr.bf16.vlgmr.msra.gmra.mrb[4].mxu1 %v3414_v28  ;;  %v3060_v28 = vld [vmem:[#allocation4 + $0x64] ss:$8 sps:$4 sm:$0xff]  }
 0x118   :  { %1864 = vmatpush1.bf16.msra.mxu0 %v3040_v35  ;;  %2246 = vmatpush1.bf16.msra.mxu1 %v3088_v63  ;;  %v3129_v35 = vld [vmem:[#allocation6 + $0x10c] ss:$12 sps:$4 sm:$0xff]  }
 0x119   :  { %1865 = vmatprep.subr.bf16.mxu0 %v3045_v36  ;;  %2247 = vmatprep.subr.bf16.mxu1 %v3093_v1  ;;  %v3127_v36 = vld [vmem:[#allocation6 + $0x108] ss:$12 sps:$4 sm:$0xff]   ;;  %v3121_v1 = vld [vmem:[#allocation6 + $0x20] ss:$12 sps:$4 sm:$0xff]  }
 0x11c   :  { %1866 = vmatpush1.bf16.msra.mxu0 %v3043_v37  ;;  %2248 = vmatpush1.bf16.msra.mxu1 %v3091_v2  ;;  %v3134_v37 = vld [vmem:[#allocation6 + $0x124] ss:$12 sps:$4 sm:$0xff]  }
 0x11d   :  { %1867 = vmatprep.subr.bf16.mxu0 %v3048_v15  ;;  %2249 = vmatprep.subr.bf16.mxu1 %v3096_v3  ;;  %v3132_v15 = vld [vmem:[#allocation6 + $0x120] ss:$12 sps:$4 sm:$0xff]   ;;  %v3125_v2 = vld [vmem:[#allocation6 + $0xf8] ss:$12 sps:$4 sm:$0xff]  }
 0x11e   :  { %v3126_v3 = vld [vmem:[#allocation6 + $0x38] ss:$12 sps:$4 sm:$0xff]  }
 0x120   :  { %1868 = vmatpush1.bf16.msra.mxu0 %v3046_v38  ;;  %2250 = vmatpush1.bf16.msra.mxu1 %v3094_v5  ;;  %v3139_v38 = vld [vmem:[#allocation6 + $0x13c] ss:$12 sps:$4 sm:$0xff]  }
 0x121   :  { %1869 = vmatprep.subr.bf16.mxu0 %v3051_v39  ;;  %2251 = vmatprep.subr.bf16.mxu1 %v3099_v6  ;;  %v3137_v39 = vld [vmem:[#allocation6 + $0x138] ss:$12 sps:$4 sm:$0xff]   ;;  %v3131_v5 = vld [vmem:[#allocation6 + $0x50] ss:$12 sps:$4 sm:$0xff]   ;;  %v3135_v6 = vld [vmem:[#allocation6 + $0x128] ss:$12 sps:$4 sm:$0xff]  }
 0x124   :  { %1870 = vmatpush1.bf16.msra.mxu0 %v3049_v40  ;;  %2252 = vmatpush1.bf16.msra.mxu1 %v3097_v7  ;;  %v1643_v40 = vlaneseq  ;;  %v3136_v7 = vld [vmem:[#allocation6 + $0x68] ss:$12 sps:$4 sm:$0xff]  }
 0x125   :  { %1871 = vmatprep.subr.bf16.mxu0 %v3054_v41  ;;  %2253 = vmatprep.subr.bf16.mxu1 %v3102_v8  ;;  %v3140_v8 = vld [vmem:[#allocation6 + $0x140] ss:$12 sps:$4 sm:$0xff]  }
 0x126   :  { %v3440_v41 = vshrl.u32 %v1643_v40, 7  ;;  %v3158_v40 = vld [vmem:[#allocation7 + $0x50] sm:$0xff]  }
 0x128   :  { %1872 = vmatpush1.bf16.msra.mxu0 %v3052_v42  ;;  %2254 = vmatpush1.bf16.msra.mxu1 %v3100_v13  ;;  %v3443_v42 = vsub.s32 0, %v3440_v41  ;;  %v3142_v13 = vld [vmem:[#allocation6 + $0x150] ss:$12 sps:$4 sm:$0xff]  }
 0x129   :  { %1873 = vmatprep.subr.bf16.mxu0 %v3057_v43  ;;  %2255 = vmatprep.subr.bf16.mxu1 %v3105_v18  ;;  %v1641_v43 = vld [vmem:[%s3481_s2] sm:$0x3]  ;;  %v3147_v18 = vld [vmem:[#allocation6 + $0x168] ss:$12 sps:$4 sm:$0xff]  }
 0x12c   :  { %1874 = vmatpush1.bf16.msra.mxu0 %v3055_v44  ;;  %2256 = vmatpush1.bf16.msra.mxu1 %v3103_v53  ;;  %v3449_v44 = vsub.s32 1, %v3440_v41 }
 0x12d   :  { %1875 = vmatprep.subr.bf16.mxu0 %v3060_v28  ;;  %2257 = vmatprep.subr.bf16.mxu1 %v3108_v24 }
 0x130   :  { %1876 = vmatpush1.bf16.msra.mxu0 %v3058_v45  ;;  %2258 = vmatpush1.bf16.msra.mxu1 %v3106_v25 }
 0x131   :  { %1877 = vmatprep.subr.bf16.mxu0 %v3063_v46  ;;  %2259 = vmatprep.subr.bf16.mxu1 %v3111_v26 }
 0x134   :  { %1878 = vmatpush1.bf16.msra.mxu0 %v3061_v47  ;;  %2260 = vmatpush1.bf16.msra.mxu1 %v3109_v27 }
 0x135   :  { %1879 = vmatprep.subr.bf16.mxu0 %v3066_v48  ;;  %2261 = vmatprep.subr.bf16.mxu1 %v3114_v29  ;;  %v1646_v48 = vrot.slane %v1641_v43, %v3443_v42 }
 0x138   :  { %1880 = vmatpush1.bf16.msra.mxu0 %v3064_v49  ;;  %2262 = vmatpush1.bf16.msra.mxu1 %v3112_v30 }
 0x139   :  { %1881 = vmatprep.subr.bf16.mxu0 %v3069_v50  ;;  %2263 = vmatprep.subr.bf16.mxu1 %v3119_v31 }
 0x13c   :  { %1882 = vmatpush1.bf16.msra.mxu0 %v3067_v12  ;;  %2264 = vmatpush1.bf16.msra.mxu1 %v3117_v32 }
 0x13d   :  { %1883 = vmatprep.subr.bf16.mxu0 %v3072_v51  ;;  %2265 = vmatprep.subr.bf16.mxu1 %v3124_v33  ;;  %v1650_v51 = vrot.slane %v1641_v43, %v3449_v44  ;;  %v3159_v43 = vld [vmem:[#allocation7 + $0x10] sm:$0xff]  }
 0x140   :  { %1884 = vmatpush1.bf16.msra.mxu0 %v3070_v52  ;;  %2266 = vmatpush1.bf16.msra.mxu1 %v3122_v34 }
 0x141   :  { %1885 = vmatprep.subr.bf16.mxu0 %v3075_v54  ;;  %2267 = vmatprep.subr.bf16.mxu1 %v3129_v35  ;;  %v3153_v35 = vld [vmem:[#allocation7] sm:$0xff]  }
 0x144   :  { %1886 = vmatpush1.bf16.msra.mxu0 %v3073_v55  ;;  %2268 = vmatpush1.bf16.msra.mxu1 %v3127_v36  ;;  %v3154_v36 = vld [vmem:[#allocation7 + $0x80] sm:$0xff]  }
 0x145   :  { %1887 = vmatprep.subr.bf16.mxu0 %v3078_v56  ;;  %2269 = vmatprep.subr.bf16.mxu1 %v3134_v37 }
 0x148   :  { %1888 = vmatpush1.bf16.msra.mxu0 %v3076_v57  ;;  %2270 = vmatpush1.bf16.msra.mxu1 %v3132_v15  ;;  %v3155_v15 = vld [vmem:[#allocation7 + $0x48] sm:$0xff]  }
 0x149   :  { %1889 = vmatprep.subr.bf16.mxu0 %v3081_v58  ;;  %2271 = vmatprep.subr.bf16.mxu1 %v3139_v38  ;;  %v3156_v38 = vld [vmem:[#allocation7 + $0x8] sm:$0xff]  }
 0x14c   :  { %1890 = vmatpush1.bf16.msra.mxu0 %v3079_v59  ;;  %2272 = vmatpush1.bf16.msra.mxu1 %v3137_v39  ;;  %v3157_v39 = vld [vmem:[#allocation7 + $0x88] sm:$0xff]  }
 0x14d   :  { %1891 = vmatprep.subr.bf16.mxu0 %v3084_v60 }
 0x150   :  { %1892 = vmatpush1.bf16.msra.mxu0 %v3082_v23 }
 0x151   :  { %1893 = vmatprep.subr.bf16.mxu0 %v3087_v61 }
 0x154   :  { %1894 = vmatpush1.bf16.msra.mxu0 %v3085_v62  ;;  %v3116_v62 = vld [vmem:[#allocation6 + $0x8] ss:$12 sps:$4 sm:$0xff]  }
 0x155   :  { %2933 = vmatprep.subr.bf16.mxu0 %v3115_v4  ;;  %v3130_v4 = vld [vmem:[#allocation6 + $0x110] ss:$12 sps:$4 sm:$0xff]  }
 0x186   :  { %v3428_v9 = vpop.f32.mrb[0].mxu0  ;;  %v3430_v10 = vpop.f32.mrb[0].mxu1 }
 0x187   :  { %v3432_v11 = vpop.f32.mrb[1].mxu0  ;;  %v1635_v14 = vmax.f32 %v3428_v9, %v3430_v10  ;;  %v3436_v16 = vpop.f32.mrb[1].mxu1  ;;  %v3141_v9 = vld [vmem:[#allocation6 + $0x80] ss:$12 sps:$4 sm:$0xff]  }
 0x188   :  { %v1386_v17 = vpop.f32.mrb[2].mxu0  ;;  %v1636_v19 = vmax.f32 %v3432_v11, %v3436_v16  ;;  %v1468_v20 = vpop.f32.mrb[2].mxu1  ;;  %v3144_v10 = vld [vmem:[#allocation6 + $0x154] ss:$12 sps:$4 sm:$0xff]   ;;  %v3145_v11 = vld [vmem:[#allocation6 + $0x158] ss:$12 sps:$4 sm:$0xff]  }
 0x189   :  { %v1387_v21 = vpop.f32.mrb[3].mxu0  ;;  %v1469_v22 = vpop.f32.mrb[3].mxu1  ;;  %2273 = vmatprep.subr.bf16.mxu1 %v3144_v10  ;;  %v3149_v16 = vld [vmem:[#allocation6 + $0x16c] ss:$12 sps:$4 sm:$0xff]   ;;  %v3150_v17 = vld [vmem:[#allocation6 + $0x170] ss:$12 sps:$4 sm:$0xff]  }
 0x18a   :  { %2274 = vmatpush1.bf16.msra.mxu1 %v3142_v13  ;;  %v3152_v20 = vld [vmem:[#allocation7 + $0x40] sm:$0xff]   ;;  %v3282_v21 = vmov 0.0  }
 0x18b   :  { %2275 = vmatprep.subr.bf16.mxu1 %v3149_v16  ;;  %v1691_v22 = vld [vmem:[%s3483_s4] sm:$0x3] }
 0x18c   :  { %v1696_v53 = vrot.slane %v1691_v22, %v3443_v42  ;;  %v1700_v24 = vrot.slane %v1691_v22, %v3449_v44 }
 0x18e   :  { %2276 = vmatpush1.bf16.msra.mxu1 %v3147_v18 }
 0x18f   :  { %2955 = vmatprep.subr.bf16.mxu1 %v3152_v20 }
 0x1ea   :  { %v1546_v28 = vpop.f32.mrb[4].mxu0  ;;  %v1628_v45 = vpop.f32.mrb[4].mxu1 }
 0x1eb   :  { %v1548_v46 = vpop.f32.mrb[5].mxu0  ;;  %v1637_v47 = vmax.f32 %v1546_v28, %v1628_v45  ;;  %v1630_v49 = vpop.f32.mrb[5].mxu1  ;;  %v3160_v28 = vld [vmem:[#allocation7 + $0x90] sm:$0xff]   ;;  %v3161_v45 = vld [vmem:[#allocation7 + $0x58] sm:$0xff]  }
 0x1ec   :  { %v1550_v50 = vpop.f32.mrb[6].mxu0  ;;  %v1638_v12 = vmax.f32 %v1548_v46, %v1630_v49  ;;  %v1632_v52 = vpop.f32.mrb[6].mxu1  ;;  %v3162_v46 = vld [vmem:[#allocation7 + $0x18] sm:$0xff]   ;;  %v3165_v49 = vld [vmem:[#allocation7 + $0x20] sm:$0xff]  }
 0x1ed   :  { %v1551_v54 = vpop.f32.mrb[7].mxu0  ;;  %v1639_v55 = vmax.f32 %v1635_v14, %v1637_v47  ;;  %v1633_v56 = vpop.f32.mrb[7].mxu1  ;;  %v3146_v14 = vld [vmem:[#allocation6 + $0x98] ss:$12 sps:$4 sm:$0xff]   ;;  %v3169_v52 = vld [vmem:[#allocation7 + $0xa8] sm:$0xff]  }
 0x1ee   :  { %v1640_v57 = vmax.f32 %v1636_v19, %v1638_v12  ;;  %v3151_v19 = vld [vmem:[#allocation6 + $0xb0] ss:$12 sps:$4 sm:$0xff]   ;;  %v3166_v50 = vld [vmem:[#allocation7 + $0xa0] sm:$0xff]   ;;  %v3167_v12 = vld [vmem:[#allocation7 + $0x68] sm:$0xff]  }
 0x1ef   :  { %v1653_v58 = vadd.f32 %v1646_v48, %v1639_v55  ;;  %v3163_v47 = vld [vmem:[#allocation7 + $0x98] sm:$0xff]   ;;  %v3164_v48 = vld [vmem:[#allocation7 + $0x60] sm:$0xff]   ;;  %v3170_v54 = vld [vmem:[#allocation7 + $0x70] sm:$0xff]  }
 0x1f0   :  { %v1654_v59 = vadd.f32 %v1650_v51, %v1640_v57  ;;  %v3168_v51 = vld [vmem:[#allocation7 + $0x28] sm:$0xff]   ;;  %v3171_v55 = vld [vmem:[#allocation7 + $0x30] sm:$0xff]   ;;  %v3173_v57 = vld [vmem:[#allocation7 + $0x78] sm:$0xff]  }
 0x1f1   :  { %v1655_v60 = vmax.f32 %v1653_v58, 0.0  ;;  %v3172_v56 = vld [vmem:[#allocation7 + $0xb0] sm:$0xff]   ;;  %v3174_v58 = vld [vmem:[#allocation7 + $0x38] sm:$0xff]  }
 0x1f2   :  { %v1656_v23 = vmax.f32 %v1654_v59, 0.0  ;;  %v3175_v59 = vld [vmem:[#allocation7 + $0xb8] sm:$0xff]  }
 0x1f3   :  { %v1657_v63 = vpack.c.bf16 %v1655_v60, %v1655_v60  ;;  %v1972_v60 = vld [vmem:[%s3485_s6] sm:$0x7] }
 0x1f4   :  { %v1658_v61 = vpack.c.bf16 %v1656_v23, %v1656_v23  ;;  %v1984_v23 = vsub.s32 2, %v3440_v41 }
 0x1f6   :  { %1895 = vmatprep.mubr.bf16.mxu0 %v1658_v61  ;;  %v1977_v61 = vrot.slane %v1972_v60, %v3443_v42 }
 0x1f7   :  { %1896 = vmatmul.mubr.bf16.vlgmr.msra.gmra.mrb[8].mxu0 %v1657_v63 }
 0x1f8   :  { %2934 = vmatpush3.bf16.msra.mxu0 %v3116_v62  ;;  %v1981_v62 = vrot.slane %v1972_v60, %v3449_v44 }
 0x1f9   :  { %2935 = vmatprep.subr.bf16.mxu0 %v3120_v0 }
 0x1fc   :  { %2936 = vmatpush3.bf16.msra.mxu0 %v3121_v1  ;;  %v1985_v1 = vrot.slane %v1972_v60, %v1984_v23 }
 0x1fd   :  { %2937 = vmatprep.subr.bf16.mxu0 %v3125_v2 }
 0x200   :  { %2938 = vmatpush3.bf16.msra.mxu0 %v3126_v3 }
 0x201   :  { %2939 = vmatprep.subr.bf16.mxu0 %v3130_v4 }
 0x204   :  { %2940 = vmatpush3.bf16.msra.mxu0 %v3131_v5 }
 0x205   :  { %2941 = vmatprep.subr.bf16.mxu0 %v3135_v6 }
 0x208   :  { %2942 = vmatpush3.bf16.msra.mxu0 %v3136_v7 }
 0x209   :  { %2943 = vmatprep.subr.bf16.mxu0 %v3140_v8 }
 0x20c   :  { %2944 = vmatpush3.bf16.msra.mxu0 %v3141_v9 }
 0x20d   :  { %2945 = vmatprep.subr.bf16.mxu0 %v3145_v11 }
 0x210   :  { %2946 = vmatpush3.bf16.msra.mxu0 %v3146_v14 }
 0x211   :  { %2947 = vmatprep.subr.bf16.mxu0 %v3150_v17 }
 0x214   :  { %2948 = vmatpush3.bf16.msra.mxu0 %v3151_v19  ;;  %v2908_v19 = vld [vmem:[%s3487_s8] ss:$0 sm:$0xff] }
 0x215   :  { %2986 = vmatprep.subr.bf16.mxu0 %v3282_v21 }
 0x2ca   :  { %v1897_v25 = vpop.f32.mrb[8].mxu0 }
 0x2cb   :  { %v1898_v26 = vadd.f32 %v1897_v25, %v1696_v53  ;;  %v1899_v27 = vpop.f32.mrb[9].mxu0 }
 0x2cc   :  { %v1900_v29 = vadd.f32 %v1899_v27, %v1700_v24  ;;  %v1901_v30 = vpop.f32.mrb[10].mxu0 }
 0x2cd   :  { %v1904_v31 = vmax.f32 %v1898_v26, 0.0  ;;  %v1902_v32 = vpop.f32.mrb[11].mxu0 }
 0x2ce   :  { %v1905_v33 = vmax.f32 %v1900_v29, 0.0 }
 0x2cf   :  { %v1906_v37 = vpack.c.bf16 %v1904_v31, %v1904_v31 }
 0x2d0   :  { %v1907_v34 = vpack.c.bf16 %v1905_v33, %v1905_v33 }
 0x2d2   :  { %2277 = vmatprep.mubr.bf16.mxu1 %v1907_v34  ;;  %2318 = vmatprep.mubr.bf16.mxu0 %v1907_v34 }
 0x2d3   :  { %2278 = vmatmul.mubr.bf16.vlgmr.msra.gmra.mrb[8].mxu1 %v1906_v37  ;;  %2319 = vmatmul.mubr.bf16.vlgmr.msra.gmra.mrb[12].mxu0 %v1906_v37 }
 0x2d4   :  { %2956 = vmatpush3.bf16.msra.mxu1 %v3153_v35  ;;  %2987 = vmatpush3.bf16.msra.mxu0 %v3154_v36 }
 0x2d5   :  { %2957 = vmatprep.subr.bf16.mxu1 %v3155_v15  ;;  %2988 = vmatprep.subr.bf16.mxu0 %v3282_v21 }
 0x2d6   :  { %3002 = vmatprep.mubr.msk.bf16.mxu0 %vm3283_vm1, %v3282_v21 }
 0x2d8   :  { %2958 = vmatpush3.bf16.msra.mxu1 %v3156_v38  ;;  %2989 = vmatpush3.bf16.msra.mxu0 %v3157_v39 }
 0x2d9   :  { %2959 = vmatprep.subr.bf16.mxu1 %v3158_v40  ;;  %2990 = vmatprep.subr.bf16.mxu0 %v3282_v21 }
 0x2dc   :  { %2960 = vmatpush3.bf16.msra.mxu1 %v3159_v43  ;;  %2991 = vmatpush3.bf16.msra.mxu0 %v3160_v28 }
 0x2dd   :  { %2961 = vmatprep.subr.bf16.mxu1 %v3161_v45  ;;  %2992 = vmatprep.subr.bf16.mxu0 %v3282_v21 }
 0x2e0   :  { %2962 = vmatpush3.bf16.msra.mxu1 %v3162_v46  ;;  %2993 = vmatpush3.bf16.msra.mxu0 %v3163_v47 }
 0x2e1   :  { %2963 = vmatprep.subr.bf16.mxu1 %v3164_v48  ;;  %2994 = vmatprep.subr.bf16.mxu0 %v3282_v21 }
 0x2e4   :  { %2964 = vmatpush3.bf16.msra.mxu1 %v3165_v49  ;;  %2995 = vmatpush3.bf16.msra.mxu0 %v3166_v50 }
 0x2e5   :  { %2965 = vmatprep.subr.bf16.mxu1 %v3167_v12  ;;  %2996 = vmatprep.subr.bf16.mxu0 %v3282_v21 }
 0x2e8   :  { %2966 = vmatpush3.bf16.msra.mxu1 %v3168_v51  ;;  %2997 = vmatpush3.bf16.msra.mxu0 %v3169_v52 }
 0x2e9   :  { %2998 = vmatprep.subr.bf16.mxu0 %v3282_v21  ;;  %2967 = vmatprep.subr.bf16.mxu1 %v3170_v54 }
 0x2ec   :  { %2968 = vmatpush3.bf16.msra.mxu1 %v3171_v55  ;;  %2999 = vmatpush3.bf16.msra.mxu0 %v3172_v56 }
 0x2ed   :  { %3000 = vmatprep.subr.bf16.mxu0 %v3282_v21  ;;  %2969 = vmatprep.subr.bf16.mxu1 %v3173_v57 }
 0x2f0   :  { %2970 = vmatpush3.bf16.msra.mxu1 %v3174_v58  ;;  %3001 = vmatpush3.bf16.msra.mxu0 %v3175_v59 }
 0x3a6   :  { %v2279_v63 = vpop.f32.mrb[8].mxu1  ;;  %v2949_v0 = vpop.f32.mrb[12].mxu0 }
 0x3a7   :  { %v2280_v2 = vadd.f32 %v2279_v63, %v1977_v61  ;;  %v2281_v3 = vpop.f32.mrb[9].mxu1  ;;  %v2950_v4 = vpop.f32.mrb[13].mxu0 }
 0x3a8   :  { %v2282_v5 = vadd.f32 %v2281_v3, %v1981_v62  ;;  %v2951_v6 = vadd.f32 %v2950_v4, %v2949_v0  ;;  %v2283_v7 = vpop.f32.mrb[10].mxu1  ;;  %v2952_v8 = vpop.f32.mrb[14].mxu0 }
 0x3a9   :  { %v2326_v9 = vmax.f32 %v2280_v2, 0.0  ;;  %v2284_v10 = vpop.f32.mrb[11].mxu1  ;;  %v2953_v11 = vpop.f32.mrb[15].mxu0 }
 0x3aa   :  { %v2327_v13 = vmax.f32 %v2282_v5, 0.0  ;;  %v2321_v14 = vadd.f32 %v2951_v6, %v1985_v1 }
 0x3ab   :  { %v2329_v42 = vpack.c.bf16 %v2326_v9, %v2326_v9 }
 0x3ac   :  { %v2330_v41 = vpack.c.bf16 %v2327_v13, %v2327_v13  ;;  %v2328_v16 = vmax.f32 %v2321_v14, 0.0 }
 0x3ae   :  { %v2331_v17 = vpack.c.bf16 %v2328_v16, %v2328_v16  ;;  %2563 = vmatprep.mubr.bf16.mxu1 %v2330_v41 }
 0x3af   :  { %2564 = vmatmul.mubr.bf16.vlgmr.msra.gmra.mrb[12].mxu1 %v2329_v42 }
 0x3b0   :  { %3003 = vmatmul.mubr.bf16.vlgmr.msra.gmra.mrb[16].mxu0 %v2331_v17 }
 0x482   :  { %v2971_v44 = vpop.f32.mrb[12].mxu1 }
 0x483   :  { %v2972_v18 = vpop.f32.mrb[13].mxu1  ;;  %v2605_v20 = vpop.f32.mrb[16].mxu0 }
 0x484   :  { %v2973_v21 = vadd.f32 %v2972_v18, %v2971_v44  ;;  %v2974_v22 = vpop.f32.mrb[14].mxu1  ;;  %v3004_v53 = vpop.f32.mrb[17].mxu0 }
 0x485   :  { %v2975_v24 = vpop.f32.mrb[15].mxu1  ;;  %v2608_v25 = vpop.f32.mrb[18].mxu0 }
 0x486   :  { %v2566_v26 = vadd.f32 %v2973_v21, %v2908_v19  ;;  %v3005_v27 = vpop.f32.mrb[19].mxu0 }
 0x488   :  { %v2606_v29 = vadd.f32 %v2605_v20, %v2566_v26 }
 0x48a   :  { %v2611_v30 = vmax.f32 %v2606_v29, 0.0 }
 0x48c   :  { %2612 = vst [vmem:[%s3488_s9] sm:$0xff] %v2611_v30 }
 0x48d   :  { %2617 = vsyncpa [#allocation3], 1 }
 0x48e   :  { %2618 = vsyncpa [#allocation5], 1 }
 0x48f   :  { %2619 = vsyncpa [#allocation8], 1 }

</bundles_post_ra>
